<compile_context>
chip_gen: v6e
topology: v6e:2x2x1
jax: 0.10.0
libtpu: 0.0.40
codegen_flags: <defaults>
</compile_context>

<pallas_src>
import functools

import numpy as np
import jax
import jax.numpy as jnp
from jax.experimental import pallas as pl
from jax.experimental.pallas import tpu as pltpu


def _gelu_tanh(x):
    # torch.nn.functional.gelu(x, approximate='tanh') -- megablocks DEFAULT_ACTIVATION_FN
    c0 = jnp.asarray(0.7978845608028654, dtype=x.dtype)   # sqrt(2/pi)
    c1 = jnp.asarray(0.044715, dtype=x.dtype)
    return 0.5 * x * (1.0 + jnp.tanh(c0 * (x + c1 * x * x * x)))


def _tpu_generation():
    """Best-effort TPU generation (5/6/7). Defaults to 6 if undetectable."""
    try:
        kind = jax.devices()[0].device_kind.lower()
    except Exception:
        return 6
    for g in (7, 6, 5, 4):
        if f"v{g}" in kind:
            return g
    return 6


def default_tile_config(gen=None):
    """Generation-specific tile defaults (see performance review)."""
    if gen is None:
        gen = _tpu_generation()
    if gen >= 7:
        # v7x: 64 MiB VMEM, ~310 FLOP/byte knee -> rb=256 is enough; don't over-tile.
        return dict(row_block=256, ffn_chunk=256, vmem_cap=56 << 20, gen=gen)
    if gen == 6:
        # v6e: 128 MiB VMEM, ~650 FLOP/byte knee -> big row blocks pay off.
        return dict(row_block=512, ffn_chunk=256, vmem_cap=100 << 20, gen=gen)
    # v5e (and older): ~240 FLOP/byte knee, 128x128 MXUs -> rb=128 already balanced.
    return dict(row_block=128, ffn_chunk=128, vmem_cap=100 << 20, gen=gen)


def _sparse_mlp_kernel(nnz_ref, cid_ref, row_ref, x_ref, w1_ref, w2_ref, o_ref,
                       acc_ref, *h_scratch, ffn_chunk, n_chunks, max_nnz,
                       resident_weights, gelu_dtype, h_dtype):
    i = pl.program_id(0)        # grid step over (nnz-balanced, permuted) token row blocks
    n = pl.program_id(1)        # n-th nonzero ffn column block of this row block
    row = row_ref[i]            # actual topology row block handled at this grid step
    col_block = n_chunks * ffn_chunk

    @pl.when(n == 0)
    def _():
        acc_ref[...] = jnp.zeros_like(acc_ref)

    # Only real (non-padded) topology entries do work.  Padded entries reuse the same
    # weight block index (host-side padding repeats the last valid id) so streamed
    # weight DMAs are elided -- this mirrors sdd/dsd never touching zero blocks.
    @pl.when(n < nnz_ref[row])
    def _():
        if resident_weights:
            # Full (expert-blocked) weights live in VMEM; pick the column block here.
            col = cid_ref[row * max_nnz + n]

            def w1_slice(off, size):
                return w1_ref[col, :, off:off + size]          # (H, size)

            def w2_slice(off, size):
                return w2_ref[col, off:off + size, :]          # (size, H)
        else:
            # Streamed path: the BlockSpec index_map already selected the column block.
            def w1_slice(off, size):
                return w1_ref[:, off:off + size]

            def w2_slice(off, size):
                return w2_ref[off:off + size, :]

        x_blk = x_ref[...]

        if n_chunks == 1:
            # MXU-filling path (v6e/v7x): one dot1 + one dot2 + one acc RMW per step.
            h = jnp.dot(x_blk, w1_slice(0, col_block),
                        preferred_element_type=jnp.float32)
            h = _gelu_tanh(h.astype(gelu_dtype)).astype(h_dtype)
            acc_ref[...] += jnp.dot(h, w2_slice(0, col_block),
                                    preferred_element_type=jnp.float32)
        else:
            # v5e path: stage gelu(h) chunks in VMEM, then ONE second dot + ONE acc
            # read-modify-write per grid step (single vst slot on v5e).
            h_ref = h_scratch[0]
            for c in range(n_chunks):          # static: offsets are compile-time consts
                off = c * ffn_chunk
                h = jnp.dot(x_blk, w1_slice(off, ffn_chunk),
                            preferred_element_type=jnp.float32)
                h_ref[:, off:off + ffn_chunk] = (
                    _gelu_tanh(h.astype(gelu_dtype)).astype(h_dtype))
            acc_ref[...] += jnp.dot(h_ref[...], w2_slice(0, col_block),
                                    preferred_element_type=jnp.float32)

    @pl.when(n == pl.num_programs(1) - 1)
    def _():
        o_ref[...] = acc_ref[...].astype(o_ref.dtype)


def _balance_row_order(nnz, num_parts=2):
    """Sort row blocks by nnz (desc) and deal them round-robin into `num_parts` equal-size
    buckets so megacore sharding of the outer grid axis sees balanced work."""
    nnz = np.asarray(nnz)
    order = np.argsort(-nnz, kind="stable").astype(np.int32)
    parts = [order[p::num_parts] for p in range(num_parts)]
    return np.concatenate(parts).astype(np.int32)


def topology_to_padded_csr(block_mask, num_cores=2):
    """Convert a (nr, nc) 0/1 block-presence mask (the stk topology at kernel block
    granularity) into padded-CSR metadata:
      nnz       : int32 (nr,)            -- nonzero column blocks per row block
      col_ids   : int32 (nr * max_nnz,)  -- flat column-block ids, padded by repeating
                                            the last valid id (same block index => DMA
                                            elided on padded steps)
      row_order : int32 (nr,)            -- nnz-balanced processing permutation
      max_nnz   : python int
      total_nnz : python int
    """
    mask = np.asarray(block_mask)
    nr, _ = mask.shape
    cols = [np.nonzero(mask[i])[0].astype(np.int32) for i in range(nr)]
    nnz = np.array([len(c) for c in cols], dtype=np.int32)
    total_nnz = int(nnz.sum())
    max_nnz = max(1, int(nnz.max())) if nr else 1
    col_ids = np.zeros((nr, max_nnz), dtype=np.int32)
    for i, c in enumerate(cols):
        if len(c):
            col_ids[i, :len(c)] = c
            col_ids[i, len(c):] = c[-1]
    row_order = _balance_row_order(nnz, num_parts=num_cores)
    return (jnp.asarray(nnz), jnp.asarray(col_ids.reshape(-1)),
            jnp.asarray(row_order), max_nnz, total_nnz)


def sparse_mlp(x, w1, w2, nnz, col_ids, row_order, *, max_nnz, total_nnz=None,
               row_block=None, col_block=256, ffn_chunk=None,
               resident_weights=None, vmem_cap=None):
    """Forward of SparseMLP: dsd(gelu(sdd(x, w1, topo)), w2), topology-compacted grid."""
    T, H = x.shape
    F = w1.shape[1]
    assert w1.shape == (H, F) and w2.shape == (F, H)
    assert H % 128 == 0, "keep hidden lane-dense (multiple of 128)"

    cfg = default_tile_config()
    gen = cfg["gen"]
    if row_block is None:
        row_block = min(cfg["row_block"], T)
    if ffn_chunk is None:
        ffn_chunk = min(cfg["ffn_chunk"], col_block)
    if vmem_cap is None:
        vmem_cap = cfg["vmem_cap"]

    assert T % row_block == 0 and F % col_block == 0
    assert row_block % 8 == 0 and col_block % ffn_chunk == 0 and ffn_chunk % 128 == 0
    nr, nc = T // row_block, F // col_block
    n_chunks = col_block // ffn_chunk
    assert nnz.shape == (nr,) and col_ids.shape == (nr * max_nnz,)
    assert row_order.shape == (nr,)
    if total_nnz is None:
        total_nnz = nr * max_nnz

    x_is_bf16 = jnp.dtype(x.dtype) == jnp.dtype(jnp.bfloat16)
    w_is_bf16 = jnp.dtype(w2.dtype) == jnp.dtype(jnp.bfloat16)
    # GELU in bf16 on v6e/v7x (bf16 VPU/EUP); f32 on v5e. h fed to dot2 in w2's dtype
    # (bf16 for bf16 weights, as in bf16 megablocks), f32 otherwise.
    gelu_dtype = jnp.bfloat16 if (x_is_bf16 and gen >= 6) else jnp.float32
    h_dtype = jnp.bfloat16 if w_is_bf16 else jnp.float32

    dt_b = jnp.dtype(x.dtype).itemsize
    wdt_b = jnp.dtype(w1.dtype).itemsize
    hdt_b = jnp.dtype(h_dtype).itemsize
    w_bytes = (w1.size + w2.size) * wdt_b
    if resident_weights is None:
        resident_weights = w_bytes <= (8 << 20)      # keep tiny expert weights in VMEM

    if resident_weights:
        # Expert-blocked layout: leading dim indexed in-kernel by the topology column id.
        w1_op = jnp.transpose(w1.reshape(H, nc, col_block), (1, 0, 2))   # (nc,H,cb)
        w2_op = w2.reshape(nc, col_block, H)                             # (nc,cb,H)
        w1_spec = pl.BlockSpec((nc, H, col_block),
                               lambda i, n, nnz, cid, row: (0, 0, 0))
        w2_spec = pl.BlockSpec((nc, col_block, H),
                               lambda i, n, nnz, cid, row: (0, 0, 0))
    else:
        w1_op, w2_op = w1, w2
        w1_spec = pl.BlockSpec(
            (H, col_block),
            lambda i, n, nnz, cid, row: (0, cid[row[i] * max_nnz + n]))
        w2_spec = pl.BlockSpec(
            (col_block, H),
            lambda i, n, nnz, cid, row: (cid[row[i] * max_nnz + n], 0))

    # VMEM budget: double-buffered x/out tiles + f32 acc + h staging + weights.
    vmem_bytes = (4 * row_block * H * dt_b                # x + out, double buffered
                  + row_block * H * 4                     # f32 accumulator scratch
                  + (row_block * col_block * hdt_b if n_chunks > 1 else 0))
    vmem_bytes += 2 * w_bytes if resident_weights else 4 * H * col_block * wdt_b
    vmem_limit = int(min(max(vmem_bytes + (4 << 20), 32 << 20), vmem_cap))

    # Advisory cost estimate so XLA can overlap surrounding ops (router/permute).
    flops = 4 * row_block * H * col_block * total_nnz
    transcendentals = row_block * col_block * total_nnz
    w_traffic = w_bytes if resident_weights else total_nnz * 2 * H * col_block * wdt_b
    cost = pl.CostEstimate(flops=int(flops), transcendentals=int(transcendentals),
                           bytes_accessed=int(2 * T * H * dt_b + w_traffic))

    kernel = functools.partial(_sparse_mlp_kernel,
                               ffn_chunk=ffn_chunk, n_chunks=n_chunks,
                               max_nnz=max_nnz, resident_weights=resident_weights,
                               gelu_dtype=gelu_dtype, h_dtype=h_dtype)

    scratch = [pltpu.VMEM((row_block, H), jnp.float32)]
    if n_chunks > 1:
        scratch.append(pltpu.VMEM((row_block, col_block), h_dtype))

    grid_spec = pltpu.PrefetchScalarGridSpec(
        num_scalar_prefetch=3,           # nnz, col_ids, row_order land in SMEM (1-D)
        grid=(nr, max_nnz),              # only (up to) max_nnz nonzero blocks per row
        in_specs=[
            # x row block: resident across the inner (nnz) axis, permuted row order.
            pl.BlockSpec((row_block, H), lambda i, n, nnz, cid, row: (row[i], 0)),
            w1_spec,
            w2_spec,
        ],
        out_specs=pl.BlockSpec((row_block, H), lambda i, n, nnz, cid, row: (row[i], 0)),
        scratch_shapes=scratch,
    )
    return pl.pallas_call(
        kernel,
        out_shape=jax.ShapeDtypeStruct((T, H), x.dtype),
        grid_spec=grid_spec,
        cost_estimate=cost,
        compiler_params=pltpu.CompilerParams(
            dimension_semantics=("parallel", "arbitrary"),
            vmem_limit_bytes=vmem_limit),
    )(nnz, col_ids, row_order, x, w1_op, w2_op)


def reference_sparse_mlp(x, w1, w2, block_mask, *, row_block, col_block):
    # Dense f32 reference: mask blocks of x@w1, gelu, then @ w2 (zero blocks contribute 0).
    h = jnp.dot(x.astype(jnp.float32), w1.astype(jnp.float32))
    mask_full = jnp.repeat(jnp.repeat(block_mask.astype(jnp.float32), row_block, axis=0),
                           col_block, axis=1)
    h = _gelu_tanh(h) * mask_full
    return jnp.dot(h, w2.astype(jnp.float32))


if __name__ == "__main__":
    # Small shapes consistent with the module:
    #   hidden_size=128, ffn_hidden_size=256, moe_num_packed_experts=2.
    H = 128
    FFN = 256
    E = 2
    F = E * FFN
    COL_BLOCK = 256            # ffn block size (= one expert's ffn columns here)

    key = jax.random.PRNGKey(0)
    kx, k1, k2, kx2 = jax.random.split(key, 4)

    # Deterministic parameter init, shapes from SparseMLP.__init__:
    #   t  : (E, hidden, ffn)   -> w1 = transpose(t, 0, 1).reshape(hidden, -1)
    #   w2p: (E, ffn, hidden)   -> w2 = w2p.view(-1, hidden)
    t = jax.random.normal(k1, (E, H, FFN), dtype=jnp.float32) * 0.02
    w1 = jnp.transpose(t, (1, 0, 2)).reshape(H, F)
    w2p = jax.random.normal(k2, (E, FFN, H), dtype=jnp.float32) * 0.02
    w2 = w2p.reshape(F, H)

    # ---- Test A: f32, explicit small tiles, streamed (per-block) weight DMA path ----
    RB_A, FC_A = 128, 128
    tokens_a = 512
    x_a = jax.random.normal(kx, (tokens_a, H), dtype=jnp.float32)
    # Synthetic block-sparse topology (column block == expert here):
    #   row blocks 0,1 -> one expert each; row block 2 -> both; row block 3 -> none.
    mask_a = jnp.array([[1, 0],
                        [0, 1],
                        [1, 1],
                        [0, 0]], dtype=jnp.int32)
    assert mask_a.shape == (tokens_a // RB_A, F // COL_BLOCK)
    nnz_a, cid_a, rord_a, mx_a, tot_a = topology_to_padded_csr(mask_a)

    out_a = sparse_mlp(x_a, w1, w2, nnz_a, cid_a, rord_a, max_nnz=mx_a, total_nnz=tot_a,
                       row_block=RB_A, col_block=COL_BLOCK, ffn_chunk=FC_A,
                       resident_weights=False)
    out_a = jax.block_until_ready(out_a)
    ref_a = reference_sparse_mlp(x_a, w1, w2, mask_a,
                                 row_block=RB_A, col_block=COL_BLOCK)
    assert out_a.shape == (tokens_a, H)
    assert jnp.allclose(out_a.astype(jnp.float32), ref_a, atol=1e-3, rtol=1e-3), \
        "f32 mismatch vs dense reference"

    # ---- Test B: bf16, generation-tuned tiles, resident-weights path (auto) ----
    cfg = default_tile_config()
    RB_B = cfg["row_block"]
    tokens_b = 2 * RB_B
    x_b = jax.random.normal(kx2, (tokens_b, H), dtype=jnp.float32).astype(jnp.bfloat16)
    mask_b = jnp.array([[1, 0],
                        [1, 1]], dtype=jnp.int32)       # topology at kernel granularity
    nnz_b, cid_b, rord_b, mx_b, tot_b = topology_to_padded_csr(mask_b)
    w1_bf, w2_bf = w1.astype(jnp.bfloat16), w2.astype(jnp.bfloat16)

    out_b = sparse_mlp(x_b, w1_bf, w2_bf, nnz_b, cid_b, rord_b, max_nnz=mx_b,
                       total_nnz=tot_b, col_block=COL_BLOCK)   # row_block/ffn_chunk auto
    out_b = jax.block_until_ready(out_b)
    ref_b = reference_sparse_mlp(x_b, w1_bf, w2_bf, mask_b,
                                 row_block=RB_B, col_block=COL_BLOCK)
    assert out_b.shape == (tokens_b, H)
    # Kernel casts gelu(h) to bf16 before dot2 (standard bf16 megablocks behavior);
    # reference keeps f32 throughout, hence the looser tolerance.
    assert jnp.allclose(out_b.astype(jnp.float32), ref_b, atol=3e-2, rtol=5e-2), \
        "bf16 mismatch vs dense reference"

    # TODO(synk): gradient_scale / ScaleGradient, DTensor resolution, and
    # MemoryOptimizedMLP's custom backward are autograd/distribution-only (no effect on
    # forward values) and are not implemented here.
    # TODO(synk): optional fp8 weight path (v7x) and a flat 1-D nonzero grid for highly
    # ragged topologies are further perf options not implemented in this version.
    print("KERNEL_OK")
</pallas_src>

<mosaic_0001>
module attributes {stable_mosaic.version = 11 : i64} {
  func.func @_sparse_mlp_kernel(%arg0: i32, %arg1: i32, %arg2: memref<4xi32, #tpu.memory_space<smem>>, %arg3: memref<8xi32, #tpu.memory_space<smem>>, %arg4: memref<4xi32, #tpu.memory_space<smem>>, %arg5: memref<128x128xf32, #tpu.memory_space<vmem>>, %arg6: memref<128x256xf32, #tpu.memory_space<vmem>>, %arg7: memref<256x128xf32, #tpu.memory_space<vmem>>, %arg8: memref<128x128xf32, #tpu.memory_space<vmem>>, %arg9: memref<128x128xf32, #tpu.memory_space<vmem>>, %arg10: memref<128x256xf32, #tpu.memory_space<vmem>>) attributes {dimension_semantics = [#tpu.dimension_semantics<parallel>, #tpu.dimension_semantics<arbitrary>], iteration_bounds = array<i64: 4, 2>, scalar_prefetch = 3 : i64, scratch_operands = 2 : i64, tpu.core_type = #tpu.core_type<tc>, window_params = [{transform_indices = @transform_0, window_bounds = array<i64: 128, 128>}, {transform_indices = @transform_1, window_bounds = array<i64: 128, 256>}, {transform_indices = @transform_2, window_bounds = array<i64: 256, 128>}, {transform_indices = @transform_3, window_bounds = array<i64: 128, 128>}]} {
    %0 = arith.index_cast %arg0 : i32 to index
    %1 = memref.load %arg4[%0] : memref<4xi32, #tpu.memory_space<smem>>
    %c0_i32 = arith.constant 0 : i32
    %2 = arith.cmpi eq, %arg1, %c0_i32 : i32
    %3 = arith.extui %2 : i1 to i32
    %c0_i32_0 = arith.constant 0 : i32
    %4 = arith.cmpi ne, %3, %c0_i32_0 : i32
    scf.if %4 {
      %cst = arith.constant 0.000000e+00 : f32
      %13 = vector.broadcast %cst : f32 to vector<128x128xf32>
      %c0 = arith.constant 0 : index
      %c0_3 = arith.constant 0 : index
      %14 = vector.load %arg9[%c0, %c0_3] : memref<128x128xf32, #tpu.memory_space<vmem>>, vector<128x128xf32>
      tpu.vector_store %arg9[%c0, %c0_3], %13 {strides = array<i32>} : memref<128x128xf32, #tpu.memory_space<vmem>>, vector<128x128xf32>,
    } else {
    }
    %5 = arith.index_cast %1 : i32 to index
    %6 = memref.load %arg2[%5] : memref<4xi32, #tpu.memory_space<smem>>
    %7 = arith.cmpi slt, %arg1, %6 : i32
    %8 = arith.extui %7 : i1 to i32
    %c0_i32_1 = arith.constant 0 : i32
    %9 = arith.cmpi ne, %8, %c0_i32_1 : i32
    scf.if %9 {
      %c0 = arith.constant 0 : index
      %c0_3 = arith.constant 0 : index
      %13 = vector.load %arg5[%c0, %c0_3] : memref<128x128xf32, #tpu.memory_space<vmem>>, vector<128x128xf32>
      %c0_4 = arith.constant 0 : index
      %c0_5 = arith.constant 0 : index
      %14 = vector.load %arg6[%c0_4, %c0_5] : memref<128x256xf32, #tpu.memory_space<vmem>>, vector<128x128xf32>
      %cst = arith.constant dense<0.000000e+00> : vector<128x128xf32>
      %15 = tpu.matmul %13, %14, %cst {dimension_numbers = #tpu.dot_dimension_numbers<[1], [0], [0], [1], [0, 0, 1, 1], [], []>} : vector<128x128xf32>, vector<128x128xf32>, vector<128x128xf32> -> vector<128x128xf32>
      %cst_6 = arith.constant 5.000000e-01 : f32
      %16 = vector.broadcast %cst_6 : f32 to vector<128x128xf32>
      %17 = arith.mulf %16, %15 : vector<128x128xf32>
      %cst_7 = arith.constant 4.471500e-02 : f32
      %18 = vector.broadcast %cst_7 : f32 to vector<128x128xf32>
      %19 = arith.mulf %18, %15 : vector<128x128xf32>
      %20 = arith.mulf %19, %15 : vector<128x128xf32>
      %21 = arith.mulf %20, %15 : vector<128x128xf32>
      %22 = arith.addf %15, %21 : vector<128x128xf32>
      %cst_8 = arith.constant 0.797884583 : f32
      %23 = vector.broadcast %cst_8 : f32 to vector<128x128xf32>
      %24 = arith.mulf %23, %22 : vector<128x128xf32>
      %25 = math.tanh %24 : vector<128x128xf32>
      %cst_9 = arith.constant 1.000000e+00 : f32
      %26 = vector.broadcast %cst_9 : f32 to vector<128x128xf32>
      %27 = arith.addf %26, %25 : vector<128x128xf32>
      %28 = arith.mulf %17, %27 : vector<128x128xf32>
      %c0_10 = arith.constant 0 : index
      %c0_11 = arith.constant 0 : index
      %29 = vector.load %arg10[%c0_10, %c0_11] : memref<128x256xf32, #tpu.memory_space<vmem>>, vector<128x128xf32>
      tpu.vector_store %arg10[%c0_10, %c0_11], %28 {strides = array<i32>} : memref<128x256xf32, #tpu.memory_space<vmem>>, vector<128x128xf32>,
      %c0_12 = arith.constant 0 : index
      %c128 = arith.constant 128 : index
      %30 = vector.load %arg6[%c0_12, %c128] : memref<128x256xf32, #tpu.memory_space<vmem>>, vector<128x128xf32>
      %cst_13 = arith.constant dense<0.000000e+00> : vector<128x128xf32>
      %31 = tpu.matmul %13, %30, %cst_13 {dimension_numbers = #tpu.dot_dimension_numbers<[1], [0], [0], [1], [0, 0, 1, 1], [], []>} : vector<128x128xf32>, vector<128x128xf32>, vector<128x128xf32> -> vector<128x128xf32>
      %cst_14 = arith.constant 5.000000e-01 : f32
      %32 = vector.broadcast %cst_14 : f32 to vector<128x128xf32>
      %33 = arith.mulf %32, %31 : vector<128x128xf32>
      %cst_15 = arith.constant 4.471500e-02 : f32
      %34 = vector.broadcast %cst_15 : f32 to vector<128x128xf32>
      %35 = arith.mulf %34, %31 : vector<128x128xf32>
      %36 = arith.mulf %35, %31 : vector<128x128xf32>
      %37 = arith.mulf %36, %31 : vector<128x128xf32>
      %38 = arith.addf %31, %37 : vector<128x128xf32>
      %cst_16 = arith.constant 0.797884583 : f32
      %39 = vector.broadcast %cst_16 : f32 to vector<128x128xf32>
      %40 = arith.mulf %39, %38 : vector<128x128xf32>
      %41 = math.tanh %40 : vector<128x128xf32>
      %cst_17 = arith.constant 1.000000e+00 : f32
      %42 = vector.broadcast %cst_17 : f32 to vector<128x128xf32>
      %43 = arith.addf %42, %41 : vector<128x128xf32>
      %44 = arith.mulf %33, %43 : vector<128x128xf32>
      %c0_18 = arith.constant 0 : index
      %c128_19 = arith.constant 128 : index
      %45 = vector.load %arg10[%c0_18, %c128_19] : memref<128x256xf32, #tpu.memory_space<vmem>>, vector<128x128xf32>
      tpu.vector_store %arg10[%c0_18, %c128_19], %44 {strides = array<i32>} : memref<128x256xf32, #tpu.memory_space<vmem>>, vector<128x128xf32>,
      %c0_20 = arith.constant 0 : index
      %c0_21 = arith.constant 0 : index
      %46 = vector.load %arg9[%c0_20, %c0_21] : memref<128x128xf32, #tpu.memory_space<vmem>>, vector<128x128xf32>
      %c0_22 = arith.constant 0 : index
      %c0_23 = arith.constant 0 : index
      %47 = vector.load %arg10[%c0_22, %c0_23] : memref<128x256xf32, #tpu.memory_space<vmem>>, vector<128x256xf32>
      %c0_24 = arith.constant 0 : index
      %c0_25 = arith.constant 0 : index
      %48 = vector.load %arg7[%c0_24, %c0_25] : memref<256x128xf32, #tpu.memory_space<vmem>>, vector<256x128xf32>
      %cst_26 = arith.constant dense<0.000000e+00> : vector<128x128xf32>
      %49 = tpu.matmul %47, %48, %cst_26 {dimension_numbers = #tpu.dot_dimension_numbers<[1], [0], [0], [1], [0, 0, 1, 1], [], []>} : vector<128x256xf32>, vector<256x128xf32>, vector<128x128xf32> -> vector<128x128xf32>
      %50 = arith.addf %46, %49 : vector<128x128xf32>
      %c0_27 = arith.constant 0 : index
      %c0_28 = arith.constant 0 : index
      %51 = vector.load %arg9[%c0_27, %c0_28] : memref<128x128xf32, #tpu.memory_space<vmem>>, vector<128x128xf32>
      tpu.vector_store %arg9[%c0_27, %c0_28], %50 {strides = array<i32>} : memref<128x128xf32, #tpu.memory_space<vmem>>, vector<128x128xf32>,
    } else {
    }
    %c1_i32 = arith.constant 1 : i32
    %10 = arith.cmpi eq, %arg1, %c1_i32 : i32
    %11 = arith.extui %10 : i1 to i32
    %c0_i32_2 = arith.constant 0 : i32
    %12 = arith.cmpi ne, %11, %c0_i32_2 : i32
    scf.if %12 {
      %c0 = arith.constant 0 : index
      %c0_3 = arith.constant 0 : index
      %13 = vector.load %arg9[%c0, %c0_3] : memref<128x128xf32, #tpu.memory_space<vmem>>, vector<128x128xf32>
      %c0_4 = arith.constant 0 : index
      %c0_5 = arith.constant 0 : index
      %14 = vector.load %arg8[%c0_4, %c0_5] : memref<128x128xf32, #tpu.memory_space<vmem>>, vector<128x128xf32>
      tpu.vector_store %arg8[%c0_4, %c0_5], %13 {strides = array<i32>} : memref<128x128xf32, #tpu.memory_space<vmem>>, vector<128x128xf32>,
    } else {
    }
    return
  }
  func.func @transform_0(%arg0: i32, %arg1: i32, %arg2: memref<4xi32, #tpu.memory_space<smem>>, %arg3: memref<8xi32, #tpu.memory_space<smem>>, %arg4: memref<4xi32, #tpu.memory_space<smem>>) -> (i32, i32) {
    %0 = arith.index_cast %arg0 : i32 to index
    %1 = memref.load %arg4[%0] : memref<4xi32, #tpu.memory_space<smem>>
    %c0_i32 = arith.constant 0 : i32
    %c0_i32_0 = arith.constant 0 : i32
    return %1, %c0_i32 : i32, i32
  }
  func.func @transform_1(%arg0: i32, %arg1: i32, %arg2: memref<4xi32, #tpu.memory_space<smem>>, %arg3: memref<8xi32, #tpu.memory_space<smem>>, %arg4: memref<4xi32, #tpu.memory_space<smem>>) -> (i32, i32) {
    %0 = arith.index_cast %arg0 : i32 to index
    %1 = memref.load %arg4[%0] : memref<4xi32, #tpu.memory_space<smem>>
    %c2_i32 = arith.constant 2 : i32
    %2 = arith.muli %1, %c2_i32 : i32
    %3 = arith.addi %2, %arg1 : i32
    %4 = arith.index_cast %3 : i32 to index
    %5 = memref.load %arg3[%4] : memref<8xi32, #tpu.memory_space<smem>>
    %c0_i32 = arith.constant 0 : i32
    %c0_i32_0 = arith.constant 0 : i32
    return %c0_i32, %5 : i32, i32
  }
  func.func @transform_2(%arg0: i32, %arg1: i32, %arg2: memref<4xi32, #tpu.memory_space<smem>>, %arg3: memref<8xi32, #tpu.memory_space<smem>>, %arg4: memref<4xi32, #tpu.memory_space<smem>>) -> (i32, i32) {
    %0 = arith.index_cast %arg0 : i32 to index
    %1 = memref.load %arg4[%0] : memref<4xi32, #tpu.memory_space<smem>>
    %c2_i32 = arith.constant 2 : i32
    %2 = arith.muli %1, %c2_i32 : i32
    %3 = arith.addi %2, %arg1 : i32
    %4 = arith.index_cast %3 : i32 to index
    %5 = memref.load %arg3[%4] : memref<8xi32, #tpu.memory_space<smem>>
    %c0_i32 = arith.constant 0 : i32
    %c0_i32_0 = arith.constant 0 : i32
    return %5, %c0_i32 : i32, i32
  }
  func.func @transform_3(%arg0: i32, %arg1: i32, %arg2: memref<4xi32, #tpu.memory_space<smem>>, %arg3: memref<8xi32, #tpu.memory_space<smem>>, %arg4: memref<4xi32, #tpu.memory_space<smem>>) -> (i32, i32) {
    %0 = arith.index_cast %arg0 : i32 to index
    %1 = memref.load %arg4[%0] : memref<4xi32, #tpu.memory_space<smem>>
    %c0_i32 = arith.constant 0 : i32
    %c0_i32_0 = arith.constant 0 : i32
    return %1, %c0_i32 : i32, i32
  }
}

</mosaic_0001>

<bundles_post_ra>
// kernel: tpu_custom_call.1
= control target key start
LH: loop header
LB: loop body
LE: loop exit
PB: predicated region body
PF: predicated region fallthrough
CT: control target
= control target key end

     0   :  { %s2300_s21 = smov [#allocation5]   ;;  %s3228_s0 = inlined_call_operand.hbm [shape: s32[4], index: 0, kind: input, shape index: {}]   ;;  %s3229_s3 = inlined_call_operand.hbm [shape: f32[512,128], index: 3, kind: input, shape index: {}]   ;;  %s3230_s4 = inlined_call_operand.hbm [shape: f32[128,512], index: 4, kind: input, shape index: {}]   ;;  %s3231_s5 = inlined_call_operand.hbm [shape: f32[512,128], index: 5, kind: input, shape index: {}]   ;;  %s3232_s6 = inlined_call_operand.hbm [shape: f32[512,128], index: 6, kind: output, shape index: {}]   ;;  %s3233_s1 = inlined_call_operand.vmem [shape: s32[8], index: 1, kind: input, shape index: {}]   ;;  %s3234_s2 = inlined_call_operand.vmem [shape: s32[4], index: 2, kind: input, shape index: {}]  }
   0x1   :  { %3260 = sst [smem:[#allocation45_spill]] %s3229_s3  ;;  %s13_s26 = sshll.u32 %s3233_s1, 4  ;;  %s14_s26 = int_to_ptr.vmem [resolvable:$true] %s13_s26 }
   0x2   :  { %3261 = sst [smem:[#allocation46_spill]] %s3230_s4  ;;  %s17_s29 = sshll.u32 %s3234_s2, 4  ;;  %s18_s29 = int_to_ptr.vmem [resolvable:$true] %s17_s29 }
   0x3   :  { %3262 = sst [smem:[#allocation47_spill]] %s3231_s5  ;;  %s2012_s30 = scalar_lea.vmem %s14_s26, 16 }
   0x4   :  { %3263 = sst [smem:[#allocation48_spill]] %s3232_s6  ;;  %p2013_p0 = scmp.ne.s32.totalorder %s14_s26, %s2012_s30 }
   0x5   :  { %12 = dma.hbm_to_smem %s3228_s0, 16, %s2300_s21, [#allocation4] }
   0x6   :  { %p2017_p1 = scmp.lt.s32.totalorder %s14_s26, %s14_s26  ;;  %p2018_p2 = scmp.lt.s32.totalorder %s2012_s30, %s2012_s30 }
   0x8   :  { %p2019_p3 = por %p2018_p2, %p2017_p1 }
   0xa   :  { %p2020_p4 = pnand %p2019_p3, %p2013_p0 }
   0xc   :  { %2023 = shalt.err (!%p2020_p4)  }
   0xd   :  { %s2301_s7 = smov [#allocation6]   ;;  %s2024_s0 = scalar_lea.vmem %s18_s29, 16 }
   0xe   :  { %16 = dma.vmem_to_smem %s14_s26, 16, %s2301_s7, [#allocation4] }
   0xf   :  { %p2025_p5 = scmp.ne.s32.totalorder %s18_s29, %s2024_s0  ;;  %p2029_p6 = scmp.lt.s32.totalorder %s18_s29, %s18_s29 }
  0x10   :  { %p2030_p7 = scmp.lt.s32.totalorder %s2024_s0, %s2024_s0 }
  0x12   :  { %p2031_p8 = por %p2030_p7, %p2029_p6 }
  0x14   :  { %p2032_p9 = pnand %p2031_p8, %p2025_p5 }
  0x16   :  { %2035 = shalt.err (!%p2032_p9)  }
  0x17   :  { %s2302_s1 = smov [#allocation7]  }
  0x18   :  { %20 = dma.vmem_to_smem %s18_s29, 16, %s2302_s1, [#allocation4] }
  0x19   :  { %2214 = dma.done.wait [#allocation4], 48 }
  0x1a   :  { %2215 = vsyncadd [#allocation4], 4294967248 }
  0x1b   :  { %22 = sfence }
  0x1c   :  { %23 = vsyncpa [#allocation9], 0 }
  0x1d   :  { %25 = vsyncpa [#allocation9 + $0x1], 0 }
  0x1e   :  { %26 = vsyncpa [#allocation12], 0 }
  0x1f   :  { %28 = vsyncpa [#allocation12 + $0x1], 0 }
  0x20   :  { %29 = vsyncpa [#allocation10], 0 }
  0x21   :  { %31 = vsyncpa [#allocation10 + $0x1], 0  ;;  %s2359_s2 = smov 0   ;;  %s2361_s8 = smov 0  }
  0x22   :  { %s2363_s9 = smov 0   ;;  %s2365_s10 = smov 0  }
  0x23   :  { %s2367_s11 = smov 0   ;;  %s2369_s12 = smov 0  }
  0x24   :  { %s2371_s13 = smov 0   ;;  %s2373_s14 = smov 0  }
  0x25   :  { %s2375_s15 = smov 0   ;;  %s2377_s16 = smov 0  }
  0x26   :  { %s2379_s17 = smov 0   ;;  %s2381_s18 = smov 0  }
  0x27   :  { %s2383_s19 = smov 0   ;;  %s2385_s20 = smov 0  }
  0x28   :  { %s2387_s21 = smov 0   ;;  %s2389_s22 = smov 0  }
  0x29   :  { %s2391_s23 = smov 0  }
  0x2a LB: > { %3264 = sst [smem:[#allocation31_spill]] %s2234_s2  ;;  %s2443_s24 = sadd.s32 4294967295, %s2298_s23   ;;  %s2298_s23 = sphi %s2391_s23, %s37_s23   ;;  %s2294_s22 = sphi %s2389_s22, %s3355_s22   ;;  %s2290_s21 = sphi %s2387_s21, %s3354_s21   ;;  %s2286_s20 = sphi %s2385_s20, %s3353_s20   ;;  %s2282_s19 = sphi %s2383_s19, %s3352_s19   ;;  %s2278_s18 = sphi %s2381_s18, %s3351_s18   ;;  %s2274_s17 = sphi %s2379_s17, %s3350_s17   ;;  %s2270_s16 = sphi %s2377_s16, %s3349_s16   ;;  %s2266_s15 = sphi %s2375_s15, %s3341_s15   ;;  %s2262_s14 = sphi %s2373_s14, %s3348_s14   ;;  %s2258_s13 = sphi %s2371_s13, %s3339_s13   ;;  %s2254_s12 = sphi %s2369_s12, %s3347_s12   ;;  %s2250_s11 = sphi %s2367_s11, %s3346_s11   ;;  %s2246_s10 = sphi %s2365_s10, %s3345_s10   ;;  %s2242_s9 = sphi %s2363_s9, %s3338_s9   ;;  %s2238_s8 = sphi %s2361_s8, %s3337_s8   ;;  %s2234_s2 = sphi %s2359_s2, %s3336_s2  }
  0x2b   : > { %3265 = sst [smem:[#allocation32_spill]] %s2238_s8  ;;  %s46_s25 = sadd.s32 1, %s2290_s21 }
  0x2c   : > { %3266 = sst [smem:[#allocation33_spill]] %s2242_s9  ;;  %p47_p10 = scmp.ge.s32.totalorder %s46_s25, 2 }
  0x2d   : > { %3267 = sst [smem:[#allocation34_spill]] %s2262_s14  ;;  %s49_s26 = sadd.s32 1, %s2294_s22 }
  0x2e   : > { %3268 = sst [smem:[#allocation35_spill]] %s2266_s15  ;;  %s1456_s28 = sadd.s32 4294967294, %s2298_s23  }
  0x2f   : > { %3269 = sst [smem:[#allocation36_spill]] %s2282_s19  ;;  %p3247_p11 = scmp.eq.s32.totalorder %s2443_s24, 0 }
  0x30   : > { %3270 = sst [smem:[#allocation37_spill]] %s2286_s20  ;;  %s3357_s26 = smov (!%p47_p10, %s49_s26), %s2294_s22 }
  0x31   : > { %s81_s27 = sld [smem:[#allocation7 + %s2294_s22]]  ;;  %s3359_s25 = smov (%p47_p10, %s46_s25), 0 }
  0x32   : > { %p51_p12 = scmp.ge.s32.totalorder %s3357_s26, 4  ;;  %p105_p13 = scmp.ne.s32.totalorder %s2262_s14, %s2258_s13 }
  0x33   : > { %p3248_p0 = scmp.eq.s32.totalorder %s2298_s23, 0  ;;  %p99_p1 = scmp.ne.s32.totalorder %s2266_s15, %s2262_s14 }
  0x34   : > { %s3361_s26 = smov (%p51_p12, %s3357_s26), 0  ;;  %p2461_p2 = por %p105_p13, %p3247_p11 }
  0x35   : > { %3271 = sst [smem:[#allocation38_spill]] %s3361_s26  ;;  %p164_p3 = scmp.ne.s32.totalorder %s2242_s9, %s2238_s8 }
  0x36   : > { %s3272_s30 = scalar_select %p2461_p2, 1, 0 }
  0x37   : > { %s1457_s29 = sshll.u32 %s81_s27, 1  ;;  %s85_s7 = sld [smem:[#allocation7 + %s3361_s26]] }
  0x38   : > { %3273 = sst [smem:[#allocation39_spill]] %s3272_s30  ;;  %s83_s1 = sadd.s32 %s2290_s21, %s1457_s29 }
  0x39   : > { %s2469_s13 = sld [smem:[#allocation7 + %s2294_s22]]  ;;  %p2476_p4 = por %p99_p1, %p3248_p0 }
  0x3a   : > { %s149_s6 = sld [smem:[#allocation7 + %s2294_s22]]  ;;  %p165_p5 = scmp.eq.s32.totalorder %s2443_s24, 7 }
  0x3b   : > { %s150_s27 = sld [smem:[#allocation7 + %s3361_s26]]  ;;  %s154_s30 = sadd.s32 1, %s2242_s9 }
  0x3c   : > { %s84_s20 = sld [smem:[#allocation6 + %s83_s1]]  ;;  %p170_p6 = scmp.ne.s32.totalorder %s2238_s8, %s2234_s2 }
  0x3d   : > { %s1458_s29 = sshll.u32 %s85_s7, 1  ;;  %p2485_p7 = por %p165_p5, %p164_p3 }
  0x3e   : > { %s87_s14 = sadd.s32 %s1458_s29, %s3359_s25  ;;  %p171_p8 = scmp.eq.s32.totalorder %s1456_s28, 7 }
  0x3f   : > { %s3275_s0 = scalar_select %p2485_p7, 1, 0 }
  0x40   : > { %s88_s5 = sld [smem:[#allocation6 + %s87_s14]]  ;;  %p2490_p9 = por %p171_p8, %p170_p6 }
  0x41   : > { %3276 = sst [smem:[#allocation40_spill]] %s3275_s0  ;;  %s151_s3 = ssub.s32 %s149_s6, %s150_s27 }
  0x42   : > { %s3277_s1 = scalar_select %p2490_p9, 1, 0 }
  0x43   : > { %p152_p10 = scmp.eq.s32.totalorder %s151_s3, 0  ;;  %p3246_p12 = scmp.lt.s32.totalorder %s2298_s23, 8 }
  0x44   : > { %3278 = sst [smem:[#allocation41_spill]] %s3277_s1  ;;  %s215_s29 = sand.u32 1, %s2266_s15  }
  0x45   : > { %s2498_s2 = scalar_select %p152_p10, %s2242_s9, %s154_s30  }
  0x46   : > { %s1466_s28 = sshll.u32 %s215_s29, 8  ;;  %s89_s6 = ssub.s32 %s84_s20, %s88_s5 }
  0x47   : > { %3279 = sst [smem:[#allocation42_spill]] %s2498_s2  ;;  %p90_p13 = scmp.eq.s32.totalorder %s89_s6, 0 }
  0x48   : > { %s217_s27 = scalar_lea.vmem [#allocation11], %s1466_s28  ;;  %s3280_s3 = sadd.s32 1, %s2266_s15 }
  0x49   : > { %s228_s1 = sshll.u32 %s217_s27, 4  ;;  %p2525_p1 = pnand %p3246_p12, %p2476_p4  ;;  %s2519_s1 = int_to_ptr.vmem [resolvable:$true] %s228_s1 }
  0x4a   : > { %s1750_s7 = scalar_select %p2476_p4, [#allocation7], [#allocation16] }
  0x4b   : > { %s2506_s0 = scalar_select %p90_p13, %s2266_s15, %s3280_s3  }
  0x4c   : > { %s1751_s30 = scalar_select %p2476_p4, %s2294_s22, 0 }
  0x4d   : > { %3281 = sst [smem:[#allocation43_spill]] %s2506_s0  ;;  %s3363_s7 = smov (!%p3246_p12, %s1750_s7), [#allocation22] }
  0x4e   : > { %s3365_s30 = smov (!%p3246_p12, %s1751_s30), 0  ;;  %p1474_p3 = scmp.ge.s32.totalorder %s2298_s23, 1 }
  0x4f   : > { %s1752_s5 = scalar_select %p2476_p4, [#allocation6], [#allocation17] }
  0x50   : > { %s218_s20 = sld [smem:[%s3363_s7 + %s3365_s30]]  ;;  %p261_p5 = scmp.lt.s32.totalorder %s2298_s23, 9 }
  0x51   : > { %s3367_s5 = smov (!%p3246_p12, %s1752_s5), [#allocation23]  ;;  %s2541_s3 = sld [smem:[#allocation7 + %s2294_s22]] }
  0x52   : > { %p2532_p6 = pnand %p1474_p3, %p261_p5  ;;  %s2544_s30 = sld [smem:[#allocation7 + %s3361_s26]] }
  0x53   : > { %p71_p8 = scmp.ne.s32.totalorder %s2274_s17, %s2270_s16  ;;  %s3284_s4 = sld [smem:[#allocation46_spill]] }
  0x54   : > { %s3283_s7 = scalar_select %p2532_p6, 1, 0 }
  0x55   : > { %p2038_p3 = pneg %p2525_p1 }
  0x56   : > { %s1467_s28 = sshll.u32 %s218_s20, 1 }
  0x57   : > { %s220_s6 = sadd.s32 %s2290_s21, %s1467_s28 }
  0x58   : > { %s3369_s6 = smov (!%p2476_p4, %s220_s6), 0  ;;  %p2559_p4 = por %p3247_p11, %p71_p8 }
  0x59   : > { %s3371_s6 = smov (!%p3246_p12, %s3369_s6), 0 }
  0x5a   : > { %s221_s27 = sld [smem:[%s3367_s5 + %s3371_s6]]  ;;  %s3286_s5 = sand.u32 1, %s2298_s23  }
  0x5b   : > { %s3285_s19 = scalar_select %p2559_p4, 1, 0 }
  0x5c   : > { %s2565_s6 = scalar_lea.sflag [#allocation12], %s3286_s5 }
  0x60   : > { %s1488_s20 = sshll.u32 %s221_s27, 8 }
  0x61   : > { %s2555_s2 = scalar_lea.hbm %s3284_s4, %s1488_s20  ;;  %s2041_s20 = scalar_lea.hbm %s3284_s4, 8192 }
  0x62   : > { %s2036_s16 = scalar_lea.hbm %s2555_s2, 4096  ;;  %p2042_p8 = scmp.lt.s32.totalorder %s2555_s2, %s3284_s4 }
  0x63   : > { %p2037_p13 = scmp.ne.s32.totalorder %s2555_s2, %s2036_s16  ;;  %p2043_p11 = scmp.lt.s32.totalorder %s2041_s20, %s2036_s16 }
  0x65   : > { %p2039_p5 = pnand %p2038_p3, %p2037_p13  ;;  %p2044_p0 = por %p2043_p11, %p2042_p8 }
  0x67   : > { %p2040_p12 = pneg %p2039_p5 }
  0x69   : > { %p2045_p10 = pnand %p2044_p0, %p2040_p12 }
  0x6b   : > { %2048 = shalt.err (!%p2045_p10)
}
  0x6c   : > { %s2049_s5 = scalar_lea.vmem %s2519_s1, 4096  ;;  %s2303_s0 = smov [#allocation11]  }
  0x6d   : > { %p2050_p9 = scmp.ne.s32.totalorder %s2519_s1, %s2049_s5  ;;  %s2054_s9 = sshll.u32 %s2303_s0, 4  ;;  %s2055_s9 = int_to_ptr.vmem [resolvable:$false] %s2054_s9 }
  0x6e   : > { %s2056_s15 = scalar_lea.vmem %s2055_s9, 8192  ;;  %p2057_p5 = scmp.lt.s32.totalorder %s2519_s1, %s2055_s9 }
  0x6f   : > { %p2052_p7 = pnand %p2050_p9, %p2038_p3  ;;  %p2058_p2 = scmp.lt.s32.totalorder %s2056_s15, %s2049_s5 }
  0x71   : > { %p2053_p13 = pneg %p2052_p7  ;;  %p2059_p4 = por %p2058_p2, %p2057_p5 }
  0x73   : > { %p2060_p6 = pnand %p2059_p4, %p2053_p13 }
  0x75   : > { %2063 = shalt.err (!%p2060_p6)
}
  0x76   : > { %s2304_s14 = smov 512   ;;  %s2305_s9 = smov 256  }
  0x77   : > { %s2306_s0 = smov 16   ;;  %s55_s16 = ssub.s32 %s2541_s3, %s2544_s30 }
  0x78   : > { %1779 = dma.hbm_to_vmem [thread:$0]  (!%p2525_p1), %s2555_s2, 4096, %s2519_s1, %s2565_s6, %s2304_s14, %s2305_s9, %s2306_s0  }
  0x79   : > { %p3287_p11 = scmp.ne.s32.totalorder %s2278_s18, %s2274_s17  ;;  %p3288_p0 = scmp.eq.s32.totalorder %s2298_s23, 0 }
  0x7a   : > { %p56_p7 = scmp.eq.s32.totalorder %s55_s16, 0  ;;  %s3289_s27 = sand.u32 1, %s2278_s18  }
  0x7b   : > { %p67_p2 = por %p3288_p0, %p3287_p11  ;;  %s1463_s20 = sshll.u32 %s3289_s27, 7 }
  0x7c   : > { %p3290_p9 = scmp.lt.s32.totalorder %s2298_s23, 8  ;;  %s3292_s29 = sadd.s32 1, %s2278_s18 }
  0x7d   : > { %s2604_s2 = scalar_select %p56_p7, %s2278_s18, %s3292_s29  }
  0x7e   : > { %p2597_p12 = pnand %p3290_p9, %p67_p2  ;;  %p3294_p1 = pmov %p3290_p9 }
  0x7f   : > { %3293 = sst [smem:[#allocation44_spill]] %s2604_s2  ;;  %s195_s30 = scalar_lea.vmem [#allocation8], %s1463_s20 }
  0x80   : > { %s1747_s1 = scalar_select %p67_p2, [#allocation7], [#allocation15] }
  0x81   : > { %s1748_s3 = scalar_select %p67_p2, %s2294_s22, 0 }
  0x82   : > { %s3373_s1 = smov (!%p3294_p1, %s1747_s1), [#allocation21]  ;;  %p3295_p6 = pmov %p3294_p1 }
  0x83   : > { %s203_s5 = sshll.u32 %s195_s30, 4  ;;  %s2614_s14 = sld [smem:[#allocation7 + %s3361_s26]]  ;;  %s2611_s5 = int_to_ptr.vmem [resolvable:$true] %s203_s5 }
  0x84   : > { %s3375_s3 = smov (!%p3295_p6, %s1748_s3), 0  ;;  %s3296_s0 = sshll.u32 %s2469_s13, 1 }
  0x85   : > { %s196_s15 = sld [smem:[%s3373_s1 + %s3375_s3]]  ;;  %s2623_s16 = sadd.s32 %s2290_s21, %s3296_s0 }
  0x86   : > { %s3297_s4 = sld [smem:[#allocation45_spill]]  ;;  %s3298_s8 = sand.u32 1, %s2278_s18  }
  0x87   : > { %s2632_s20 = scalar_lea.sflag [#allocation9], %s3298_s8  ;;  %p2066_p8 = pneg %p2597_p12 }
  0x8b   : > { %s1487_s9 = sshll.u32 %s196_s15, 11 }
  0x8c   : > { %s2628_s2 = scalar_lea.hbm %s3297_s4, %s1487_s9  ;;  %s2069_s30 = scalar_lea.hbm %s3297_s4, 8192 }
  0x8d   : > { %s2064_s1 = scalar_lea.hbm %s2628_s2, 2048  ;;  %p2070_p11 = scmp.lt.s32.totalorder %s2628_s2, %s3297_s4 }
  0x8e   : > { %p2065_p3 = scmp.ne.s32.totalorder %s2628_s2, %s2064_s1  ;;  %p2071_p0 = scmp.lt.s32.totalorder %s2069_s30, %s2064_s1 }
  0x90   : > { %p2067_p13 = pnand %p2066_p8, %p2065_p3  ;;  %p2072_p2 = por %p2071_p0, %p2070_p11 }
  0x92   : > { %p2068_p5 = pneg %p2067_p13 }
  0x94   : > { %p2073_p7 = pnand %p2072_p2, %p2068_p5 }
  0x96   : > { %2076 = shalt.err (!%p2073_p7)
}
  0x97   : > { %s2077_s8 = scalar_lea.vmem %s2611_s5, 2048  ;;  %s2307_s9 = smov [#allocation8]  }
  0x98   : > { %p2078_p9 = scmp.ne.s32.totalorder %s2611_s5, %s2077_s8  ;;  %s2082_s27 = sshll.u32 %s2307_s9, 4  ;;  %s2083_s27 = int_to_ptr.vmem [resolvable:$false] %s2082_s27 }
  0x99   : > { %s2084_s29 = scalar_lea.vmem %s2083_s27, 4096  ;;  %p2085_p3 = scmp.lt.s32.totalorder %s2611_s5, %s2083_s27 }
  0x9a   : > { %p2080_p1 = pnand %p2078_p9, %p2066_p8  ;;  %p2086_p13 = scmp.lt.s32.totalorder %s2084_s29, %s2077_s8 }
  0x9c   : > { %p2081_p6 = pneg %p2080_p1  ;;  %p2087_p4 = por %p2086_p13, %p2085_p3 }
  0x9e   : > { %p2088_p10 = pnand %p2087_p4, %p2081_p6 }
  0xa0   : > { %2091 = shalt.err (!%p2088_p10)
}
  0xa1   : > { %s3255_s1 = smov 128   ;;  %s3256_s13 = smov 8  }
  0xa2   : > { %1772 = dma.hbm_to_vmem [thread:$0]  (!%p2597_p12), %s2628_s2, 2048, %s2611_s5, %s2632_s20, %s3255_s1, %s3255_s1, %s3256_s13  }
  0xa3   : > { %p3299_p10 = scmp.eq.s32.totalorder %s2298_s23, 0  ;;  %p3300_p4 = scmp.ne.s32.totalorder %s2254_s12, %s2250_s11 }
  0xa4   : > { %p3302_p5 = scmp.eq.s32.totalorder %s2443_s24, 0  ;;  %p3303_p11 = scmp.ne.s32.totalorder %s2250_s11, %s2246_s10 }
  0xa5   : > { %p2661_p8 = por %p3300_p4, %p3299_p10  ;;  %s118_s28 = sld [smem:[#allocation6 + %s2623_s16]] }
  0xa6   : > { %p2670_p0 = por %p3303_p11, %p3302_p5  ;;  %s1460_s2 = sshll.u32 %s2614_s14, 1 }
  0xa7   : > { %s121_s5 = sadd.s32 %s1460_s2, %s3359_s25  ;;  %s126_s15 = sadd.s32 1, %s2254_s12 }
  0xa8   : > { %s3304_s30 = scalar_select %p2670_p0, 1, 0 }
  0xa9   : > { %s122_s20 = sld [smem:[#allocation6 + %s121_s5]]  ;;  %p3305_p12 = scmp.lt.s32.totalorder %s2298_s23, 8 }
  0xaa   : > { %s1755_s10 = scalar_select %p2661_p8, [#allocation7], [#allocation18] }
  0xab   : > { %s1756_s0 = scalar_select %p2661_p8, %s2294_s22, 0 }
  0xac   : > { %s3377_s10 = smov (!%p3305_p12, %s1755_s10), [#allocation24]  ;;  %p3306_p2 = pmov %p3305_p12 }
  0xad   : > { %s1757_s8 = scalar_select %p2661_p8, [#allocation6], [#allocation19] }
  0xae   : > { %s3379_s0 = smov (!%p3306_p2, %s1756_s0), 0  ;;  %s240_s27 = sand.u32 1, %s2254_s12  }
  0xaf   : > { %s123_s9 = ssub.s32 %s118_s28, %s122_s20  ;;  %s243_s16 = sld [smem:[%s3377_s10 + %s3379_s0]] }
  0xb0   : > { %p124_p7 = scmp.eq.s32.totalorder %s123_s9, 0  ;;  %p3307_p9 = pmov %p3306_p2 }
  0xb1   : > { %p3309_p6 = pmov %p3306_p2  ;;  %s1470_s5 = sshll.u32 %s240_s27, 8 }
  0xb2   : > { %s2690_s14 = scalar_select %p124_p7, %s2254_s12, %s126_s15  }
  0xb3   : > { %p2697_p1 = pnand %p3307_p9, %p2661_p8  ;;  %s3381_s8 = smov (!%p3309_p6, %s1757_s8), [#allocation25] }
  0xb4   : > { %p3310_p3 = pmov %p3306_p2  ;;  %s242_s20 = scalar_lea.vmem [#allocation13], %s1470_s5 }
  0xb5   : > { %s1471_s2 = sshll.u32 %s243_s16, 1  ;;  %s253_s15 = sshll.u32 %s242_s20, 4  ;;  %s2708_s15 = int_to_ptr.vmem [resolvable:$true] %s253_s15 }
  0xb6   : > { %s245_s1 = sadd.s32 %s2290_s21, %s1471_s2  ;;  %s3311_s13 = sld [smem:[#allocation47_spill]] }
  0xb7   : > { %s3383_s1 = smov (!%p2661_p8, %s245_s1), 0  ;;  %p2094_p10 = pneg %p2697_p1 }
  0xb8   : > { %s3385_s1 = smov (!%p3310_p3, %s3383_s1), 0 }
  0xb9   : > { %s246_s28 = sld [smem:[%s3381_s8 + %s3385_s1]] }
  0xbc   : > { %s3312_s4 = smov %s3311_s13 }
  0xbd   : > { %s2097_s8 = scalar_lea.hbm %s3312_s4, 8192 }
  0xbf   : > { %s1489_s10 = sshll.u32 %s246_s28, 12 }
  0xc0   : > { %s2713_s26 = scalar_lea.hbm %s3311_s13, %s1489_s10 }
  0xc1   : > { %s2092_s16 = scalar_lea.hbm %s2713_s26, 4096  ;;  %p2098_p5 = scmp.lt.s32.totalorder %s2713_s26, %s3312_s4 }
  0xc2   : > { %p2093_p13 = scmp.ne.s32.totalorder %s2713_s26, %s2092_s16  ;;  %p2099_p11 = scmp.lt.s32.totalorder %s2097_s8, %s2092_s16 }
  0xc4   : > { %p2095_p4 = pnand %p2094_p10, %p2093_p13  ;;  %p2100_p12 = por %p2099_p11, %p2098_p5 }
  0xc6   : > { %p2096_p8 = pneg %p2095_p4 }
  0xc8   : > { %p2101_p2 = pnand %p2100_p12, %p2096_p8 }
  0xca   : > { %2104 = shalt.err (!%p2101_p2)
}
  0xcb   : > { %s2105_s13 = scalar_lea.vmem %s2708_s15, 4096  ;;  %s2310_s5 = smov [#allocation13]  }
  0xcc   : > { %p2106_p7 = scmp.ne.s32.totalorder %s2708_s15, %s2105_s13  ;;  %s2110_s28 = sshll.u32 %s2310_s5, 4  ;;  %s2111_s28 = int_to_ptr.vmem [resolvable:$false] %s2110_s28 }
  0xcd   : > { %s2112_s20 = scalar_lea.vmem %s2111_s28, 8192  ;;  %p2113_p3 = scmp.lt.s32.totalorder %s2708_s15, %s2111_s28 }
  0xce   : > { %p2108_p9 = pnand %p2106_p7, %p2094_p10  ;;  %p2114_p13 = scmp.lt.s32.totalorder %s2112_s20, %s2105_s13 }
  0xd0   : > { %p2109_p6 = pneg %p2108_p9  ;;  %p2115_p4 = por %p2114_p13, %p2113_p3 }
  0xd2   : > { %p2116_p0 = pnand %p2115_p4, %p2109_p6 }
  0xd4   : > { %2119 = shalt.err (!%p2116_p0)
}
  0xd5   : > { %s3313_s10 = smov 8   ;;  %s3314_s0 = smov 128  }
  0xd6   : > { %1786 = dma.hbm_to_vmem [thread:$0]  (!%p2697_p1), %s2713_s26, 4096, %s2708_s15, %s2565_s6, %s3314_s0, %s3314_s0, %s3313_s10  }
  0xd7   : > { %p3315_p10 = scmp.ne.s32.totalorder %s3283_s7, 0 }
  0xd8   : > { %s267_s9 = sand.u32 (!%p3315_p10), 1, %s2274_s17   ;;  %p3316_p0 = scmp.ne.s32.totalorder (!%p3315_p10), %s3285_s19, 0 }
  0xd9   : > { %265 = sbr.rel (%p3315_p10) target bundleno = 878 (0x36e), region = 32  ;;  %s1475_s16 = sshll.u32 (!%p3315_p10), %s267_s9, 7 }
  0xda   : > { %s268_s1 = scalar_lea.sflag (!%p3315_p10), [#allocation9], %s267_s9  ;;  %s2740_s3 = scalar_lea.vmem (!%p3315_p10), [#allocation8], %s1475_s16 }
  0xde   : > { %2217 = dma.done.wait (%p3316_p0), %s268_s1, 2048  }
  0xdf   : > { %2219 = vsyncadd (%p3316_p0), %s268_s1, 4294965248  ;;  %s3317_s29 = sld [smem:[#allocation34_spill]]  ;;  %s276_s27 = sand.u32 1, %s2443_s24  }
  0xe0   : > { %s3318_s8 = sld [smem:[#allocation39_spill]]  ;;  %s277_s7 = scalar_lea.sflag [#allocation12], %s276_s27 }
  0xe5   : > { %s278_s26 = sand.u32 1, %s3317_s29  }
  0xe6   : > { %s1476_s6 = sshll.u32 %s278_s26, 8  ;;  %p3319_p1 = scmp.ne.s32.totalorder %s3318_s8, 0 }
  0xe7   : > { %s2748_s15 = scalar_lea.vmem [#allocation11], %s1476_s6 }
  0xe8   : > { %2221 = dma.done.wait (%p3319_p1), %s277_s7, 4096  }
  0xe9   : > { %2223 = vsyncadd (%p3319_p1), %s277_s7, 4294963200  ;;  %s287_s2 = sand.u32 1, %s2250_s11   ;;  %p3320_p8 = scmp.ne.s32.totalorder %s3304_s30, 0 }
  0xea   : > { %s1477_s13 = sshll.u32 %s287_s2, 8 }
  0xeb   : > { %s2755_s19 = scalar_lea.vmem [#allocation13], %s1477_s13 }
  0xec   : > { %2225 = dma.done.wait (%p3320_p8), %s277_s7, 4096  }
  0xed   : > { %2227 = vsyncadd (%p3320_p8), %s277_s7, 4294963200  ;;  %s3321_s24 = sld [smem:[#allocation32_spill]] }
  0xee   : > { %s3322_s5 = sld [smem:[#allocation37_spill]] }
  0xef   : > { %s3323_s9 = sld [smem:[#allocation36_spill]] }
  0xf3   : > { %s319_s28 = sand.u32 1, %s3321_s24  }
  0xf4   : > { %s336_s20 = sld [smem:[#allocation7 + %s3322_s5]]  ;;  %s1478_s10 = sshll.u32 %s319_s28, 7 }
  0xf5   : > { %s2765_s0 = scalar_lea.vmem [#allocation14], %s1478_s10  ;;  %p1479_p5 = scmp.ne.s32.totalorder %s3323_s9, 0 }
  0xf7   : > { %340 = sbr.rel (%p1479_p5) target bundleno = 261 (0x105), region = 48 }
  0xfc   : > { %v2311_v0 = vmov 0.0  }
  0xfd   : > { %341 = vst [vmem:[#allocation2 + $0x30] sm:$0xff] %v2311_v0  ;;  %342 = vst [vmem:[#allocation2] sm:$0xff] %v2311_v0 }
  0xfe   : > { %343 = vst [vmem:[#allocation2 + $0x58] sm:$0xff] %v2311_v0  ;;  %344 = vst [vmem:[#allocation2 + $0x18] sm:$0xff] %v2311_v0 }
  0xff   : > { %345 = vst [vmem:[#allocation2 + $0x50] sm:$0xff] %v2311_v0  ;;  %346 = vst [vmem:[#allocation2 + $0x68] sm:$0xff] %v2311_v0 }
 0x100   : > { %347 = vst [vmem:[#allocation2 + $0x8] sm:$0xff] %v2311_v0  ;;  %348 = vst [vmem:[#allocation2 + $0x48] sm:$0xff] %v2311_v0 }
 0x101   : > { %349 = vst [vmem:[#allocation2 + $0x40] sm:$0xff] %v2311_v0  ;;  %350 = vst [vmem:[#allocation2 + $0x20] sm:$0xff] %v2311_v0 }
 0x102   : > { %351 = vst [vmem:[#allocation2 + $0x10] sm:$0xff] %v2311_v0  ;;  %352 = vst [vmem:[#allocation2 + $0x38] sm:$0xff] %v2311_v0 }
 0x103   : > { %353 = vst [vmem:[#allocation2 + $0x60] sm:$0xff] %v2311_v0  ;;  %354 = vst [vmem:[#allocation2 + $0x70] sm:$0xff] %v2311_v0 }
 0x104   : > { %355 = vst [vmem:[#allocation2 + $0x78] sm:$0xff] %v2311_v0  ;;  %356 = vst [vmem:[#allocation2 + $0x28] sm:$0xff] %v2311_v0 }
 0x105 PF: > { %s357_s30 = sld [smem:[#allocation5 + %s336_s20]] }
 0x106   : > { %s3324_s16 = sld [smem:[#allocation36_spill]] }
 0x10c   : > { %p1480_p11 = scmp.ge.s32.totalorder %s3324_s16, %s357_s30 }
 0x10e   : > { %361 = sbr.rel (%p1480_p11) target bundleno = 825 (0x339), region = 52 }
 0x113   : > { %v393_v1 = vld [vmem:[%s2748_s15 + $0xf0] sm:$0xff]  ;;  %v392_v2 = vld [vmem:[%s2748_s15 + $0xe0] sm:$0xff]  ;;  %v2790_v18 = vld [vmem:[%s2740_s3 + $0x8] sm:$0xff] }
 0x114   : > { %1635 = vmatprep.subr.mxu1 %v393_v1  ;;  %v391_v3 = vld [vmem:[%s2748_s15 + $0xd0] sm:$0xff]  ;;  %v390_v4 = vld [vmem:[%s2748_s15 + $0xc0] sm:$0xff]  ;;  %v714_v19 = vld [vmem:[%s2748_s15 + $0xf8] sm:$0xff] }
 0x115   : > { %1636 = vmatpush3.msra.mxu1 %v393_v1  ;;  %v2774_v5 = vld [vmem:[%s2740_s3] sm:$0xff]  ;;  %v389_v6 = vld [vmem:[%s2748_s15 + $0xb0] sm:$0xff]  ;;  %v713_v21 = vld [vmem:[%s2748_s15 + $0xe8] sm:$0xff] }
 0x116   : > { %1637 = vmatprep.subr.mxu1 %v392_v2  ;;  %1667 = vmatprep.mubr.f32.mxu1 %v2774_v5  ;;  %v388_v7 = vld [vmem:[%s2748_s15 + $0xa0] sm:$0xff]  ;;  %v387_v8 = vld [vmem:[%s2748_s15 + $0x90] sm:$0xff]  ;;  %v2800_v22 = vld [vmem:[%s2740_s3 + $0x18] sm:$0xff] }
 0x117   : > { %1638 = vmatpush3.msra.mxu1 %v392_v2  ;;  %v386_v9 = vld [vmem:[%s2748_s15 + $0x80] sm:$0xff]  ;;  %v385_v10 = vld [vmem:[%s2748_s15 + $0x70] sm:$0xff]  ;;  %v712_v23 = vld [vmem:[%s2748_s15 + $0xd8] sm:$0xff] }
 0x118   : > { %1639 = vmatprep.subr.mxu1 %v391_v3  ;;  %v384_v11 = vld [vmem:[%s2748_s15 + $0x60] sm:$0xff]  ;;  %v383_v12 = vld [vmem:[%s2748_s15 + $0x50] sm:$0xff]  ;;  %v711_v25 = vld [vmem:[%s2748_s15 + $0xc8] sm:$0xff] }
 0x119   : > { %1640 = vmatpush3.msra.mxu1 %v391_v3  ;;  %v382_v13 = vld [vmem:[%s2748_s15 + $0x40] sm:$0xff]  ;;  %v381_v14 = vld [vmem:[%s2748_s15 + $0x30] sm:$0xff]  ;;  %v2810_v26 = vld [vmem:[%s2740_s3 + $0x28] sm:$0xff] }
 0x11a   : > { %1641 = vmatprep.subr.mxu1 %v390_v4  ;;  %v380_v15 = vld [vmem:[%s2748_s15 + $0x20] sm:$0xff]  ;;  %v379_v16 = vld [vmem:[%s2748_s15 + $0x10] sm:$0xff]  ;;  %v710_v27 = vld [vmem:[%s2748_s15 + $0xb8] sm:$0xff] }
 0x11b   : > { %1642 = vmatpush3.msra.mxu1 %v390_v4  ;;  %v378_v17 = vld [vmem:[%s2748_s15] sm:$0xff]  ;;  %v2794_v20 = vld [vmem:[%s2740_s3 + $0x10] sm:$0xff]  ;;  %v709_v29 = vld [vmem:[%s2748_s15 + $0xa8] sm:$0xff] }
 0x11c   : > { %1643 = vmatprep.subr.mxu1 %v389_v6  ;;  %v2804_v24 = vld [vmem:[%s2740_s3 + $0x20] sm:$0xff]  ;;  %v368_v28 = vld [vmem:[%s2740_s3 + $0x30] sm:$0xff]  ;;  %v369_v30 = vld [vmem:[%s2740_s3 + $0x38] sm:$0xff] }
 0x11d   : > { %1644 = vmatpush3.msra.mxu1 %v389_v6  ;;  %v708_v31 = vld [vmem:[%s2748_s15 + $0x98] sm:$0xff]  ;;  %v370_v32 = vld [vmem:[%s2740_s3 + $0x40] sm:$0xff]  ;;  %v707_v33 = vld [vmem:[%s2748_s15 + $0x88] sm:$0xff] }
 0x11e   : > { %1645 = vmatprep.subr.mxu1 %v388_v7  ;;  %v371_v34 = vld [vmem:[%s2740_s3 + $0x48] sm:$0xff]  ;;  %v706_v35 = vld [vmem:[%s2748_s15 + $0x78] sm:$0xff]  ;;  %v372_v36 = vld [vmem:[%s2740_s3 + $0x50] sm:$0xff] }
 0x11f   : > { %1646 = vmatpush3.msra.mxu1 %v388_v7  ;;  %v705_v37 = vld [vmem:[%s2748_s15 + $0x68] sm:$0xff]  ;;  %v373_v38 = vld [vmem:[%s2740_s3 + $0x58] sm:$0xff]  ;;  %v374_v40 = vld [vmem:[%s2740_s3 + $0x60] sm:$0xff] }
 0x120   : > { %1647 = vmatprep.subr.mxu1 %v387_v8  ;;  %v704_v39 = vld [vmem:[%s2748_s15 + $0x58] sm:$0xff]  ;;  %v703_v41 = vld [vmem:[%s2748_s15 + $0x48] sm:$0xff]  ;;  %v376_v44 = vld [vmem:[%s2740_s3 + $0x70] sm:$0xff] }
 0x121   : > { %1648 = vmatpush3.msra.mxu1 %v387_v8  ;;  %v375_v42 = vld [vmem:[%s2740_s3 + $0x68] sm:$0xff]  ;;  %v702_v43 = vld [vmem:[%s2748_s15 + $0x38] sm:$0xff]  ;;  %v1098_v51 = vld [vmem:[%s2755_s19 + $0xf0] sm:$0xff] }
 0x122   : > { %1649 = vmatprep.subr.mxu1 %v386_v9  ;;  %v701_v45 = vld [vmem:[%s2748_s15 + $0x28] sm:$0xff]  ;;  %v377_v46 = vld [vmem:[%s2740_s3 + $0x78] sm:$0xff]  ;;  %v1082_v52 = vld [vmem:[%s2755_s19 + $0x70] sm:$0xff] }
 0x123   : > { %1650 = vmatpush3.msra.mxu1 %v386_v9  ;;  %v700_v47 = vld [vmem:[%s2748_s15 + $0x18] sm:$0xff]  ;;  %v699_v48 = vld [vmem:[%s2748_s15 + $0x8] sm:$0xff]  ;;  %v1096_v55 = vld [vmem:[%s2755_s19 + $0xe0] sm:$0xff] }
 0x124   : > { %1651 = vmatprep.subr.mxu1 %v385_v10  ;;  %v1099_v49 = vld [vmem:[%s2755_s19 + $0xf8] sm:$0xff]  ;;  %v1097_v53 = vld [vmem:[%s2755_s19 + $0xe8] sm:$0xff]  ;;  %v1080_v56 = vld [vmem:[%s2755_s19 + $0x60] sm:$0xff] }
 0x125   : > { %1652 = vmatpush3.msra.mxu1 %v385_v10  ;;  %1555 = vmatprep.subr.mxu0 %v1099_v49  ;;  %v1083_v50 = vld [vmem:[%s2755_s19 + $0x78] sm:$0xff]  ;;  %v1081_v54 = vld [vmem:[%s2755_s19 + $0x68] sm:$0xff]  ;;  %v1094_v59 = vld [vmem:[%s2755_s19 + $0xd0] sm:$0xff] }
 0x126   : > { %1653 = vmatprep.subr.mxu1 %v384_v11  ;;  %1556 = vmatpush3.msra.mxu0 %v1083_v50  ;;  %v1095_v57 = vld [vmem:[%s2755_s19 + $0xd8] sm:$0xff]  ;;  %v1078_v60 = vld [vmem:[%s2755_s19 + $0x50] sm:$0xff]  ;;  %v1093_v61 = vld [vmem:[%s2755_s19 + $0xc8] sm:$0xff] }
 0x127   : > { %1654 = vmatpush3.msra.mxu1 %v384_v11  ;;  %1557 = vmatprep.subr.mxu0 %v1098_v51  ;;  %v1079_v58 = vld [vmem:[%s2755_s19 + $0x58] sm:$0xff]  ;;  %v1077_v62 = vld [vmem:[%s2755_s19 + $0x48] sm:$0xff]  ;;  %v1092_v63 = vld [vmem:[%s2755_s19 + $0xc0] sm:$0xff] }
 0x128   : > { %1655 = vmatprep.subr.mxu1 %v383_v12  ;;  %1558 = vmatpush3.msra.mxu0 %v1082_v52  ;;  %v1076_v0 = vld [vmem:[%s2755_s19 + $0x40] sm:$0xff]  ;;  %v1091_v1 = vld [vmem:[%s2755_s19 + $0xb8] sm:$0xff]  ;;  %v1090_v3 = vld [vmem:[%s2755_s19 + $0xb0] sm:$0xff] }
 0x129   : > { %1656 = vmatpush3.msra.mxu1 %v383_v12  ;;  %1559 = vmatprep.subr.mxu0 %v1097_v53  ;;  %v1075_v2 = vld [vmem:[%s2755_s19 + $0x38] sm:$0xff]  ;;  %v1074_v4 = vld [vmem:[%s2755_s19 + $0x30] sm:$0xff]  ;;  %v1073_v6 = vld [vmem:[%s2755_s19 + $0x28] sm:$0xff] }
 0x12a   : > { %1657 = vmatprep.subr.mxu1 %v382_v13  ;;  %1560 = vmatpush3.msra.mxu0 %v1081_v54  ;;  %v1088_v7 = vld [vmem:[%s2755_s19 + $0xa0] sm:$0xff]  ;;  %v1087_v9 = vld [vmem:[%s2755_s19 + $0x98] sm:$0xff]  ;;  %v1086_v11 = vld [vmem:[%s2755_s19 + $0x90] sm:$0xff] }
 0x12b   : > { %1658 = vmatpush3.msra.mxu1 %v382_v13  ;;  %1561 = vmatprep.subr.mxu0 %v1096_v55  ;;  %v1072_v8 = vld [vmem:[%s2755_s19 + $0x20] sm:$0xff]  ;;  %v1071_v10 = vld [vmem:[%s2755_s19 + $0x18] sm:$0xff]  ;;  %v1070_v12 = vld [vmem:[%s2755_s19 + $0x10] sm:$0xff] }
 0x12c   : > { %1659 = vmatprep.subr.mxu1 %v381_v14  ;;  %1562 = vmatpush3.msra.mxu0 %v1080_v56  ;;  %v1085_v13 = vld [vmem:[%s2755_s19 + $0x88] sm:$0xff] }
 0x12d   : > { %1660 = vmatpush3.msra.mxu1 %v381_v14  ;;  %1563 = vmatprep.subr.mxu0 %v1095_v57  ;;  %v1069_v14 = vld [vmem:[%s2755_s19 + $0x8] sm:$0xff] }
 0x12e   : > { %1661 = vmatprep.subr.mxu1 %v380_v15  ;;  %1564 = vmatpush3.msra.mxu0 %v1079_v58 }
 0x12f   : > { %1662 = vmatpush3.msra.mxu1 %v380_v15  ;;  %1565 = vmatprep.subr.mxu0 %v1094_v59  ;;  %v1084_v15 = vld [vmem:[%s2755_s19 + $0x80] sm:$0xff] }
 0x130   : > { %1663 = vmatprep.subr.mxu1 %v379_v16  ;;  %1566 = vmatpush3.msra.mxu0 %v1078_v60 }
 0x131   : > { %1664 = vmatpush3.msra.mxu1 %v379_v16  ;;  %1567 = vmatprep.subr.mxu0 %v1093_v61  ;;  %v1068_v16 = vld [vmem:[%s2755_s19] sm:$0xff] }
 0x132   : > { %1665 = vmatprep.subr.mxu1 %v378_v17  ;;  %1568 = vmatpush3.msra.mxu0 %v1077_v62 }
 0x133   : > { %1666 = vmatpush3.msra.mxu1 %v378_v17  ;;  %1569 = vmatprep.subr.mxu0 %v1092_v63 }
 0x134   : > { %1668 = vmatmul.mubr.f32.vlgmr.msra.gmra.mxu1 %v2790_v18  ;;  %1691 = vmatprep.subr.mxu1 %v714_v19 }
 0x135   : > { %1692 = vmatpush3.msra.mxu1 %v714_v19  ;;  %1670 = vmatprep.mubr.f32.mxu1 %v2794_v20 }
 0x136   : > { %1693 = vmatprep.subr.mxu1 %v713_v21  ;;  %1570 = vmatpush3.msra.mxu0 %v1076_v0 }
 0x137   : > { %1694 = vmatpush3.msra.mxu1 %v713_v21  ;;  %1571 = vmatprep.subr.mxu0 %v1091_v1 }
 0x138   : > { %1671 = vmatmul.mubr.f32.gmra.mxu1 %v2800_v22  ;;  %1695 = vmatprep.subr.mxu1 %v712_v23 }
 0x139   : > { %1696 = vmatpush3.msra.mxu1 %v712_v23  ;;  %1673 = vmatprep.mubr.f32.mxu1 %v2804_v24 }
 0x13a   : > { %1697 = vmatprep.subr.mxu1 %v711_v25  ;;  %1572 = vmatpush3.msra.mxu0 %v1075_v2 }
 0x13b   : > { %1698 = vmatpush3.msra.mxu1 %v711_v25  ;;  %1573 = vmatprep.subr.mxu0 %v1090_v3 }
 0x13c   : > { %1674 = vmatmul.mubr.f32.gmra.mxu1 %v2810_v26  ;;  %1699 = vmatprep.subr.mxu1 %v710_v27 }
 0x13d   : > { %1700 = vmatpush3.msra.mxu1 %v710_v27  ;;  %1676 = vmatprep.mubr.f32.mxu1 %v368_v28 }
 0x13e   : > { %1701 = vmatprep.subr.mxu1 %v709_v29  ;;  %1574 = vmatpush3.msra.mxu0 %v1074_v4 }
 0x13f   : > { %1702 = vmatpush3.msra.mxu1 %v709_v29 }
 0x140   : > { %1677 = vmatmul.mubr.f32.gmra.mxu1 %v369_v30  ;;  %1703 = vmatprep.subr.mxu1 %v708_v31 }
 0x141   : > { %1704 = vmatpush3.msra.mxu1 %v708_v31  ;;  %1679 = vmatprep.mubr.f32.mxu1 %v370_v32 }
 0x142   : > { %1705 = vmatprep.subr.mxu1 %v707_v33 }
 0x143   : > { %1706 = vmatpush3.msra.mxu1 %v707_v33 }
 0x144   : > { %1680 = vmatmul.mubr.f32.gmra.mxu1 %v371_v34  ;;  %1707 = vmatprep.subr.mxu1 %v706_v35 }
 0x145   : > { %1708 = vmatpush3.msra.mxu1 %v706_v35  ;;  %1682 = vmatprep.mubr.f32.mxu1 %v372_v36 }
 0x146   : > { %1709 = vmatprep.subr.mxu1 %v705_v37 }
 0x147   : > { %1710 = vmatpush3.msra.mxu1 %v705_v37 }
 0x148   : > { %1683 = vmatmul.mubr.f32.gmra.mxu1 %v373_v38  ;;  %1711 = vmatprep.subr.mxu1 %v704_v39 }
 0x149   : > { %1712 = vmatpush3.msra.mxu1 %v704_v39  ;;  %1685 = vmatprep.mubr.f32.mxu1 %v374_v40 }
 0x14a   : > { %1713 = vmatprep.subr.mxu1 %v703_v41 }
 0x14b   : > { %1714 = vmatpush3.msra.mxu1 %v703_v41 }
 0x14c   : > { %1686 = vmatmul.mubr.f32.gmra.mxu1 %v375_v42  ;;  %1715 = vmatprep.subr.mxu1 %v702_v43 }
 0x14d   : > { %1716 = vmatpush3.msra.mxu1 %v702_v43  ;;  %1688 = vmatprep.mubr.f32.mxu1 %v376_v44 }
 0x14e   : > { %1717 = vmatprep.subr.mxu1 %v701_v45 }
 0x14f   : > { %1718 = vmatpush3.msra.mxu1 %v701_v45 }
 0x150   : > { %1689 = vmatmul.mubr.f32.gmra.mxu1 %v377_v46  ;;  %1719 = vmatprep.subr.mxu1 %v700_v47 }
 0x151   : > { %1720 = vmatpush3.msra.mxu1 %v700_v47  ;;  %1723 = vmatprep.mubr.f32.mxu1 %v2774_v5  ;;  %v1089_v5 = vld [vmem:[%s2755_s19 + $0xa8] sm:$0xff] }
 0x152   : > { %1721 = vmatprep.subr.mxu1 %v699_v48  ;;  %1575 = vmatprep.subr.mxu0 %v1089_v5 }
 0x153   : > { %1722 = vmatpush3.msra.mxu1 %v699_v48  ;;  %1576 = vmatpush3.msra.mxu0 %v1073_v6 }
 0x154   : > { %1724 = vmatmul.mubr.f32.vlgmr.msra.gmra.mxu1 %v2790_v18  ;;  %1577 = vmatprep.subr.mxu0 %v1088_v7 }
 0x155   : > { %1726 = vmatprep.mubr.f32.mxu1 %v2794_v20  ;;  %1578 = vmatpush3.msra.mxu0 %v1072_v8 }
 0x156   : > { %1579 = vmatprep.subr.mxu0 %v1087_v9 }
 0x157   : > { %1580 = vmatpush3.msra.mxu0 %v1071_v10 }
 0x158   : > { %1727 = vmatmul.mubr.f32.gmra.mxu1 %v2800_v22  ;;  %1581 = vmatprep.subr.mxu0 %v1086_v11 }
 0x159   : > { %1729 = vmatprep.mubr.f32.mxu1 %v2804_v24  ;;  %1582 = vmatpush3.msra.mxu0 %v1070_v12 }
 0x15a   : > { %1583 = vmatprep.subr.mxu0 %v1085_v13 }
 0x15b   : > { %1584 = vmatpush3.msra.mxu0 %v1069_v14 }
 0x15c   : > { %1730 = vmatmul.mubr.f32.gmra.mxu1 %v2810_v26  ;;  %1585 = vmatprep.subr.mxu0 %v1084_v15 }
 0x15d   : > { %1732 = vmatprep.mubr.f32.mxu1 %v368_v28  ;;  %1586 = vmatpush3.msra.mxu0 %v1068_v16 }
 0x160   : > { %1733 = vmatmul.mubr.f32.gmra.mxu1 %v369_v30 }
 0x161   : > { %1735 = vmatprep.mubr.f32.mxu1 %v370_v32 }
 0x164   : > { %1736 = vmatmul.mubr.f32.gmra.mxu1 %v371_v34 }
 0x165   : > { %1738 = vmatprep.mubr.f32.mxu1 %v372_v36 }
 0x168   : > { %1739 = vmatmul.mubr.f32.gmra.mxu1 %v373_v38 }
 0x169   : > { %1741 = vmatprep.mubr.f32.mxu1 %v374_v40 }
 0x16c   : > { %1742 = vmatmul.mubr.f32.gmra.mxu1 %v375_v42 }
 0x16d   : > { %1744 = vmatprep.mubr.f32.mxu1 %v376_v44 }
 0x170   : > { %1745 = vmatmul.mubr.f32.gmra.mxu1 %v377_v46 }
 0x1f4   : > { %v2873_v17 = vpop.f32.mrf.mxu1 }
 0x1f5   : > { %v556_v27 = vmul.f32 0.044715, %v2873_v17 }
 0x1f6   : > { %v2875_v18 = vpop.f32.mrf.mxu1 }
 0x1f7   : > { %v555_v29 = vmul.f32 0.044715, %v2875_v18  ;;  %v572_v31 = vmul.f32 %v2873_v17, %v556_v27 }
 0x1f8   : > { %v2877_v19 = vpop.f32.mrf.mxu1 }
 0x1f9   : > { %v571_v33 = vmul.f32 %v555_v29, %v2875_v18  ;;  %v588_v35 = vmul.f32 %v2873_v17, %v572_v31  ;;  %v558_v36 = vmul.f32 0.044715, %v2877_v19 }
 0x1fa   : > { %v2879_v20 = vpop.f32.mrf.mxu1 }
 0x1fb   : > { %v557_v37 = vmul.f32 0.044715, %v2879_v20  ;;  %v587_v39 = vmul.f32 %v571_v33, %v2875_v18  ;;  %v604_v41 = vadd.f32 %v2873_v17, %v588_v35  ;;  %v574_v42 = vmul.f32 %v2877_v19, %v558_v36 }
 0x1fc   : > { %v2881_v21 = vpop.f32.mrf.mxu1 }
 0x1fd   : > { %v573_v43 = vmul.f32 %v557_v37, %v2879_v20  ;;  %v603_v46 = vadd.f32 %v587_v39, %v2875_v18  ;;  %v560_v47 = vmul.f32 0.044715, %v2881_v21  ;;  %v620_v51 = vmul.f32 0.7978846, %v604_v41 }
 0x1fe   : > { %v2883_v22 = vpop.f32.mrf.mxu1  ;;  %v590_v52 = vmul.f32 %v2877_v19, %v574_v42 }
 0x1ff   : > { %v589_v53 = vmul.f32 %v573_v43, %v2879_v20  ;;  %v619_v58 = vmul.f32 0.7978846, %v603_v46  ;;  %v576_v59 = vmul.f32 %v2881_v21, %v560_v47  ;;  %v559_v60 = vmul.f32 0.044715, %v2883_v22 }
 0x200   : > { %v2885_v23 = vpop.f32.mrf.mxu1  ;;  %v606_v2 = vadd.f32 %v2877_v19, %v590_v52  ;;  %1940 = vtanh.f32 %v620_v51 }
 0x201   : > { %v562_v62 = vmul.f32 0.044715, %v2885_v23  ;;  %v605_v3 = vadd.f32 %v589_v53, %v2879_v20  ;;  %v592_v10 = vmul.f32 %v2881_v21, %v576_v59  ;;  %v575_v11 = vmul.f32 %v559_v60, %v2883_v22 }
 0x202   : > { %v2887_v24 = vpop.f32.mrf.mxu1  ;;  %1942 = vtanh.f32 %v619_v58  ;;  %v622_v36 = vmul.f32 0.7978846, %v606_v2 }
 0x203   : > { %v578_v14 = vmul.f32 %v2885_v23, %v562_v62  ;;  %v561_v29 = vmul.f32 0.044715, %v2887_v24  ;;  %v621_v37 = vmul.f32 0.7978846, %v605_v3  ;;  %v608_v42 = vadd.f32 %v2881_v21, %v592_v10 }
 0x204   : > { %v2889_v25 = vpop.f32.mrf.mxu1  ;;  %v591_v43 = vmul.f32 %v575_v11, %v2883_v22 }
 0x205   : > { %v594_v52 = vmul.f32 %v2885_v23, %v578_v14  ;;  %v577_v53 = vmul.f32 %v561_v29, %v2887_v24  ;;  %v624_v60 = vmul.f32 0.7978846, %v608_v42 }
 0x206   : > { %v2891_v26 = vpop.f32.mrf.mxu1  ;;  %v607_v62 = vadd.f32 %v591_v43, %v2883_v22 }
 0x207   : > { %v593_v10 = vmul.f32 %v577_v53, %v2887_v24 }
 0x208   : > { %v2894_v28 = vpop.f32.mrf.mxu1  ;;  %v623_v14 = vmul.f32 0.7978846, %v607_v62 }
 0x209   : > { %v609_v42 = vadd.f32 %v593_v10, %v2887_v24 }
 0x20a   : > { %v2897_v30 = vpop.f32.mrf.mxu1 }
 0x20c   : > { %v2900_v32 = vpop.f32.mrf.mxu1 }
 0x20e   : > { %v2903_v34 = vpop.f32.mrf.mxu1 }
 0x210   : > { %v2908_v38 = vpop.f32.mrf.mxu1 }
 0x212   : > { %v2911_v40 = vpop.f32.mrf.mxu1 }
 0x214   : > { %v2916_v44 = vpop.f32.mrf.mxu1 }
 0x215   : > { %v877_v45 = vmul.f32 0.044715, %v2916_v44 }
 0x216   : > { %v2921_v48 = vpop.f32.mrf.mxu1 }
 0x217   : > { %v893_v49 = vmul.f32 %v2916_v44, %v877_v45  ;;  %v876_v50 = vmul.f32 0.044715, %v2921_v48 }
 0x218   : > { %v2927_v54 = vpop.f32.mrf.mxu1 }
 0x219   : > { %v909_v55 = vmul.f32 %v2916_v44, %v893_v49  ;;  %v892_v56 = vmul.f32 %v876_v50, %v2921_v48  ;;  %v879_v57 = vmul.f32 0.044715, %v2927_v54 }
 0x21a   : > { %v2934_v61 = vpop.f32.mrf.mxu1 }
 0x21b   : > { %v925_v63 = vadd.f32 %v2916_v44, %v909_v55  ;;  %v895_v0 = vmul.f32 %v2927_v54, %v879_v57  ;;  %v878_v1 = vmul.f32 0.044715, %v2934_v61  ;;  %v908_v5 = vmul.f32 %v892_v56, %v2921_v48 }
 0x21c   : > { %v2942_v4 = vpop.f32.mrf.mxu1  ;;  %v564_v57 = vmul.f32 0.044715, %v2889_v25 }
 0x21d   : > { %v941_v6 = vmul.f32 0.7978846, %v925_v63  ;;  %v911_v7 = vmul.f32 %v2927_v54, %v895_v0  ;;  %v894_v8 = vmul.f32 %v878_v1, %v2934_v61  ;;  %v881_v9 = vmul.f32 0.044715, %v2942_v4 }
 0x21e   : > { %v2950_v12 = vpop.f32.mrf.mxu1  ;;  %v924_v13 = vadd.f32 %v908_v5, %v2921_v48  ;;  %v2982_v0 = vmul.f32 0.5, %v2873_v17  ;;  %v610_v17 = vadd.f32 %v2885_v23, %v594_v52  ;;  %v580_v11 = vmul.f32 %v2889_v25, %v564_v57 }
 0x21f   : > { %v910_v15 = vmul.f32 %v894_v8, %v2934_v61  ;;  %v897_v16 = vmul.f32 %v2942_v4, %v881_v9  ;;  %v880_v27 = vmul.f32 0.044715, %v2950_v12  ;;  %v927_v31 = vadd.f32 %v2927_v54, %v911_v7  ;;  %v1941_v9 = vpop.eup %1940 }
 0x220   : > { %v2959_v33 = vpop.f32.mrf.mxu1  ;;  %v940_v35 = vmul.f32 0.7978846, %v924_v13  ;;  %1944 = vtanh.f32 %v941_v6  ;;  %v539_v8 = vmul.f32 0.5, %v2875_v18  ;;  %v563_v13 = vmul.f32 0.044715, %v2891_v26 }
 0x221   : > { %v926_v39 = vadd.f32 %v910_v15, %v2934_v61  ;;  %v896_v41 = vmul.f32 %v880_v27, %v2950_v12  ;;  %v913_v45 = vmul.f32 %v2942_v4, %v897_v16  ;;  %v883_v50 = vmul.f32 0.044715, %v2959_v33  ;;  %v1943_v27 = vpop.eup %1942 }
 0x222   : > { %v2966_v46 = vpop.f32.mrf.mxu1  ;;  %1946 = vtanh.f32 %v940_v35  ;;  %v943_v55 = vmul.f32 0.7978846, %v927_v31  ;;  %v2996_v15 = vmul.f32 0.5, %v2879_v20  ;;  %v2999_v16 = vmul.f32 0.5, %v2877_v19 }
 0x223   : > { %v942_v47 = vmul.f32 0.7978846, %v926_v39  ;;  %v912_v49 = vmul.f32 %v896_v41, %v2950_v12  ;;  %v882_v51 = vmul.f32 0.044715, %v2966_v46  ;;  %1948 = vtanh.f32 %v621_v37 }
 0x224   : > { %v2973_v56 = vpop.f32.mrf.mxu1  ;;  %v929_v1 = vadd.f32 %v2942_v4, %v913_v45  ;;  %v899_v2 = vmul.f32 %v2959_v33, %v883_v50  ;;  %v3008_v20 = vmul.f32 0.5, %v2883_v22  ;;  %v3011_v19 = vmul.f32 0.5, %v2881_v21 }
 0x225   : > { %v928_v58 = vadd.f32 %v912_v49, %v2950_v12  ;;  %v898_v59 = vmul.f32 %v882_v51, %v2966_v46  ;;  %1950 = vtanh.f32 %v942_v47  ;;  %v885_v31 = vmul.f32 0.044715, %v2973_v56 }
 0x226   : > { %v2979_v63 = vpop.f32.mrf.mxu1  ;;  %1952 = vtanh.f32 %v622_v36  ;;  %v945_v18 = vmul.f32 0.7978846, %v929_v1  ;;  %v915_v29 = vmul.f32 %v2959_v33, %v899_v2  ;;  %v626_v41 = vmul.f32 0.7978846, %v610_v17 }
 0x227   : > { %v884_v3 = vmul.f32 0.044715, %v2979_v63  ;;  %v944_v5 = vmul.f32 0.7978846, %v928_v58  ;;  %v914_v6 = vmul.f32 %v898_v59, %v2966_v46  ;;  %1954 = vtanh.f32 %v943_v55 }
 0x228   : > { %v2988_v7 = vpop.f32.mrf.mxu1  ;;  %1956 = vtanh.f32 %v624_v60  ;;  %v596_v43 = vmul.f32 %v2889_v25, %v580_v11  ;;  %v579_v45 = vmul.f32 %v563_v13, %v2891_v26  ;;  %v566_v47 = vmul.f32 0.044715, %v2894_v28 }
 0x229   : > { %v900_v35 = vmul.f32 %v884_v3, %v2979_v63  ;;  %v930_v36 = vadd.f32 %v914_v6, %v2966_v46  ;;  %1958 = vtanh.f32 %v944_v5  ;;  %v860_v49 = vmul.f32 0.5, %v2921_v48 }
 0x22a   : > { %v3005_v37 = vpop.f32.mrf.mxu1  ;;  %v651_v50 = vadd.f32 1.0, %v1943_v27  ;;  %1960 = vtanh.f32 %v623_v14  ;;  %v931_v22 = vadd.f32 %v2959_v33, %v915_v29  ;;  %v901_v21 = vmul.f32 %v2973_v56, %v885_v31 }
 0x22b   : > { %v916_v52 = vmul.f32 %v900_v35, %v2979_v63  ;;  %1962 = vtanh.f32 %v945_v18  ;;  %v946_v53 = vmul.f32 0.7978846, %v930_v36  ;;  %v886_v55 = vmul.f32 0.044715, %v3005_v37 }
 0x22c   : > { %v3022_v57 = vpop.f32.mrf.mxu1  ;;  %v625_v60 = vmul.f32 0.7978846, %v609_v42  ;;  %v612_v48 = vadd.f32 %v2889_v25, %v596_v43  ;;  %v595_v62 = vmul.f32 %v579_v45, %v2891_v26  ;;  %v565_v1 = vmul.f32 0.044715, %v2897_v30 }
 0x22d   : > { %v1945_v39 = vpop.eup %1944  ;;  %v667_v5 = vmul.f32 %v651_v50, %v539_v8  ;;  %v861_v6 = vmul.f32 0.5, %v2916_v44  ;;  %v652_v17 = vadd.f32 1.0, %v1941_v9  ;;  %v947_v11 = vmul.f32 0.7978846, %v931_v22 }
 0x22e   : > { %v973_v59 = vadd.f32 1.0, %v1945_v39  ;;  %v917_v13 = vmul.f32 %v2973_v56, %v901_v21  ;;  %v932_v14 = vadd.f32 %v916_v52, %v2979_v63  ;;  %v887_v27 = vmul.f32 0.044715, %v2988_v7  ;;  %v3032_v31 = vpop.f32.mrf.mxu1 }
 0x22f   : > { %v1947_v51 = vpop.eup %1946  ;;  %v902_v29 = vmul.f32 %v886_v55, %v3005_v37  ;;  %1964 = vtanh.f32 %v946_v53  ;;  %v611_v44 = vadd.f32 %v595_v62, %v2891_v26  ;;  %v582_v9 = vmul.f32 %v2894_v28, %v566_v47 }
 0x230   : > { %v972_v58 = vadd.f32 1.0, %v1947_v51  ;;  %v1949_v2 = vpop.eup %1948  ;;  %v989_v35 = vmul.f32 %v973_v59, %v861_v6  ;;  %v581_v39 = vmul.f32 %v565_v1, %v2897_v30  ;;  %1966 = vtanh.f32 %v626_v41  ;;  %v3046_v59 = vpop.f32.mrf.mxu1 }
 0x231   : > { %v668_v42 = vmul.f32 %v652_v17, %v2982_v0  ;;  %v862_v43 = vmul.f32 0.5, %v2934_v61  ;;  %v653_v45 = vadd.f32 1.0, %v1949_v2  ;;  %1968 = vtanh.f32 %v625_v60 }
 0x232   : > { %v988_v3 = vmul.f32 %v972_v58, %v860_v49  ;;  %v1951_v10 = vpop.eup %1950  ;;  %v933_v50 = vadd.f32 %v2973_v56, %v917_v13  ;;  %v903_v51 = vmul.f32 %v2988_v7, %v887_v27  ;;  %v888_v22 = vmul.f32 0.044715, %v3032_v31 }
 0x233   : > { %v1953_v18 = vpop.eup %1952  ;;  %v974_v36 = vadd.f32 1.0, %v1951_v10  ;;  %1970 = vtanh.f32 %v947_v11  ;;  %v948_v47 = vmul.f32 0.7978846, %v932_v14  ;;  %v918_v21 = vmul.f32 %v902_v29, %v3005_v37  ;;  %v3058_v29 = vpop.f32.mrf.mxu1 }
 0x234   : > { %1164 = vmatprep.mubr.f32.mxu0 %v988_v3  ;;  %v1955_v8 = vpop.eup %1954  ;;  %v628_v55 = vmul.f32 0.7978846, %v612_v48  ;;  %v598_v0 = vmul.f32 %v2894_v28, %v582_v9  ;;  %v597_v61 = vmul.f32 %v581_v39, %v2897_v30  ;;  %v567_v58 = vmul.f32 0.044715, %v2903_v34 }
 0x235   : > { %1165 = vmatmul.mubr.f32.vlgmr.msra.gmra.mxu0 %v667_v5  ;;  %v1957_v49 = vpop.eup %1956  ;;  %v990_v52 = vmul.f32 %v974_v36, %v862_v43  ;;  %v975_v41 = vadd.f32 1.0, %v1955_v8  ;;  %v627_v60 = vmul.f32 0.7978846, %v611_v44  ;;  %v669_v62 = vmul.f32 %v653_v45, %v2996_v15 }
 0x236   : > { %1169 = vmatprep.mubr.f32.mxu0 %v989_v35  ;;  %v1959_v53 = vpop.eup %1958  ;;  %v863_v1 = vmul.f32 0.5, %v2927_v54  ;;  %v654_v2 = vadd.f32 1.0, %v1953_v18  ;;  %v949_v5 = vmul.f32 0.7978846, %v933_v50  ;;  %v919_v48 = vmul.f32 %v2988_v7, %v903_v51 }
 0x237   : > { %v1961_v3 = vpop.eup %1960  ;;  %v889_v6 = vmul.f32 0.044715, %v3022_v57  ;;  %v904_v17 = vmul.f32 %v888_v22, %v3032_v31  ;;  %v934_v11 = vadd.f32 %v918_v21, %v3005_v37  ;;  %v976_v14 = vadd.f32 1.0, %v1959_v53 }
 0x238   : > { %v1963_v10 = vpop.eup %1962  ;;  %v991_v13 = vmul.f32 %v975_v41, %v863_v1  ;;  %1972 = vtanh.f32 %v948_v47  ;;  %v614_v27 = vadd.f32 %v2894_v28, %v598_v0  ;;  %v613_v15 = vadd.f32 %v597_v61, %v2897_v30 }
 0x239   : > { %1170 = vmatmul.mubr.f32.gmra.mxu0 %v668_v42  ;;  %v568_v54 = vmul.f32 0.044715, %v2900_v32  ;;  %v583_v18 = vmul.f32 %v567_v58, %v2903_v34  ;;  %v670_v35 = vmul.f32 %v654_v2, %v2999_v16  ;;  %v864_v36 = vmul.f32 0.5, %v2950_v12 }
 0x23a   : > { %1174 = vmatprep.mubr.f32.mxu0 %v990_v52  ;;  %v655_v8 = vadd.f32 1.0, %v1961_v3  ;;  %1974 = vtanh.f32 %v627_v60  ;;  %v935_v44 = vadd.f32 %v2988_v7, %v919_v48  ;;  %v905_v9 = vmul.f32 %v3022_v57, %v889_v6 }
 0x23b   : > { %v920_v39 = vmul.f32 %v904_v17, %v3032_v31  ;;  %1976 = vtanh.f32 %v949_v5  ;;  %v950_v42 = vmul.f32 0.7978846, %v934_v11  ;;  %v890_v43 = vmul.f32 0.044715, %v3058_v29 }
 0x23c   : > { %v992_v45 = vmul.f32 %v976_v14, %v864_v36  ;;  %v977_v50 = vadd.f32 1.0, %v1963_v10  ;;  %v1965_v51 = vpop.eup %1964  ;;  %v629_v22 = vmul.f32 0.7978846, %v613_v15  ;;  %v584_v16 = vmul.f32 %v2900_v32, %v568_v54 }
 0x23d   : > { %1175 = vmatmul.mubr.f32.gmra.mxu0 %v669_v62  ;;  %v599_v12 = vmul.f32 %v583_v18, %v2903_v34  ;;  %1978 = vtanh.f32 %v628_v55  ;;  %v1967_v47 = vpop.eup %1966  ;;  %v569_v21 = vmul.f32 0.044715, %v2911_v40  ;;  %v671_v52 = vmul.f32 %v655_v8, %v3008_v20 }
 0x23e   : > { %1179 = vmatprep.mubr.f32.mxu0 %v991_v13  ;;  %v865_v41 = vmul.f32 0.5, %v2942_v4  ;;  %v656_v53 = vadd.f32 1.0, %v1957_v49  ;;  %v1969_v0 = vpop.eup %1968  ;;  %v951_v61 = vmul.f32 0.7978846, %v935_v44  ;;  %v921_v58 = vmul.f32 %v3022_v57, %v905_v9 }
 0x23f   : > { %v936_v60 = vadd.f32 %v920_v39, %v3032_v31  ;;  %v891_v62 = vmul.f32 0.044715, %v3046_v59  ;;  %v906_v55 = vmul.f32 %v890_v43, %v3058_v29  ;;  %v978_v3 = vadd.f32 1.0, %v1965_v51 }
 0x240   : > { %v1971_v1 = vpop.eup %1970  ;;  %v993_v2 = vmul.f32 %v977_v50, %v865_v41  ;;  %1980 = vtanh.f32 %v950_v42  ;;  %v630_v5 = vmul.f32 0.7978846, %v614_v27  ;;  %v600_v20 = vmul.f32 %v2900_v32, %v584_v16 }
 0x241   : > { %1180 = vmatmul.mubr.f32.gmra.mxu0 %v670_v35  ;;  %v615_v4 = vadd.f32 %v599_v12, %v2903_v34  ;;  %v570_v49 = vmul.f32 0.044715, %v2908_v38  ;;  %v585_v48 = vmul.f32 %v569_v21, %v2911_v40  ;;  %v672_v6 = vmul.f32 %v656_v53, %v3011_v19 }
 0x242   : > { %1184 = vmatprep.mubr.f32.mxu0 %v992_v45  ;;  %v866_v17 = vmul.f32 0.5, %v2966_v46  ;;  %v657_v10 = vadd.f32 1.0, %v1969_v0  ;;  %v937_v11 = vadd.f32 %v3022_v57, %v921_v58  ;;  %v952_v13 = vmul.f32 0.7978846, %v936_v60 }
 0x243   : > { %v907_v14 = vmul.f32 %v3046_v59, %v891_v62  ;;  %1982 = vtanh.f32 %v629_v22  ;;  %v922_v27 = vmul.f32 %v906_v55, %v3058_v29  ;;  %v979_v54 = vadd.f32 1.0, %v1971_v1 }
 0x244   : > { %v994_v15 = vmul.f32 %v978_v3, %v866_v17  ;;  %1984 = vtanh.f32 %v951_v61  ;;  %v616_v35 = vadd.f32 %v2900_v32, %v600_v20  ;;  %v586_v36 = vmul.f32 %v2908_v38, %v570_v49 }
 0x245   : > { %1185 = vmatmul.mubr.f32.gmra.mxu0 %v671_v52  ;;  %v1973_v18 = vpop.eup %1972  ;;  %v545_v46 = vmul.f32 0.5, %v2887_v24  ;;  %v631_v19 = vmul.f32 0.7978846, %v615_v4  ;;  %v601_v8 = vmul.f32 %v585_v48, %v2911_v40  ;;  %v867_v44 = vmul.f32 0.5, %v2959_v33 }
 0x246   : > { %1189 = vmatprep.mubr.f32.mxu0 %v993_v2  ;;  %1986 = vtanh.f32 %v630_v5  ;;  %v953_v39 = vmul.f32 0.7978846, %v937_v11  ;;  %v923_v42 = vmul.f32 %v3046_v59, %v907_v14  ;;  %v658_v45 = vadd.f32 1.0, %v1967_v47 }
 0x247   : > { %v1975_v9 = vpop.eup %1974  ;;  %v673_v43 = vmul.f32 %v657_v10, %v545_v46  ;;  %v938_v51 = vadd.f32 %v922_v27, %v3058_v29  ;;  %v995_v22 = vmul.f32 %v979_v54, %v867_v44  ;;  %v980_v16 = vadd.f32 1.0, %v1973_v18 }
 0x248   : > { %v1977_v50 = vpop.eup %1976  ;;  %1988 = vtanh.f32 %v952_v13  ;;  %v546_v24 = vmul.f32 0.5, %v2885_v23  ;;  %v632_v21 = vmul.f32 0.7978846, %v616_v35  ;;  %v602_v33 = vmul.f32 %v2908_v38, %v586_v36 }
 0x249   : > { %1190 = vmatmul.mubr.f32.gmra.mxu0 %v672_v6  ;;  %v617_v52 = vadd.f32 %v601_v8, %v2911_v40  ;;  %v868_v41 = vmul.f32 0.5, %v2979_v63  ;;  %v939_v47 = vadd.f32 %v3046_v59, %v923_v42  ;;  %v659_v0 = vadd.f32 1.0, %v1975_v9 }
 0x24a   : > { %1194 = vmatprep.mubr.f32.mxu0 %v994_v15  ;;  %v1979_v12 = vpop.eup %1978  ;;  %v674_v53 = vmul.f32 %v658_v45, %v546_v24  ;;  %1990 = vtanh.f32 %v631_v19  ;;  %v954_v61 = vmul.f32 0.7978846, %v938_v51  ;;  %v981_v60 = vadd.f32 1.0, %v1977_v50 }
 0x24b   : > { %v996_v58 = vmul.f32 %v980_v16, %v868_v41  ;;  %1992 = vtanh.f32 %v953_v39  ;;  %v547_v23 = vmul.f32 0.5, %v2891_v26  ;;  %v618_v1 = vadd.f32 %v2908_v38, %v602_v33 }
 0x24c   : > { %v869_v55 = vmul.f32 0.5, %v2973_v56  ;;  %v633_v2 = vmul.f32 0.7978846, %v617_v52  ;;  %v660_v3 = vadd.f32 1.0, %v1979_v12  ;;  %1994 = vtanh.f32 %v632_v21 }
 0x24d   : > { %1195 = vmatmul.mubr.f32.gmra.mxu0 %v673_v43  ;;  %v1981_v62 = vpop.eup %1980  ;;  %v675_v63 = vmul.f32 %v659_v0, %v547_v23  ;;  %v955_v20 = vmul.f32 0.7978846, %v939_v47  ;;  %1996 = vtanh.f32 %v954_v61  ;;  %v548_v6 = vmul.f32 0.5, %v2889_v25 }
 0x24e   : > { %1199 = vmatprep.mubr.f32.mxu0 %v995_v22  ;;  %v997_v4 = vmul.f32 %v981_v60, %v869_v55  ;;  %v982_v49 = vadd.f32 1.0, %v1981_v62  ;;  %v870_v26 = vmul.f32 0.5, %v3005_v37  ;;  %v634_v10 = vmul.f32 0.7978846, %v618_v1  ;;  %v1020_v60 = vld [vmem:[#allocation2 + $0x30] sm:$0xff]  ;;  %v1021_v55 = vld [vmem:[#allocation2] sm:$0xff] }
 0x24f   : > { %v676_v11 = vmul.f32 %v660_v3, %v548_v6  ;;  %1998 = vtanh.f32 %v633_v2  ;;  %v549_v15 = vmul.f32 0.5, %v2897_v30  ;;  %v871_v54 = vmul.f32 0.5, %v2988_v7 }
 0x250   : > { %v1983_v5 = vpop.eup %1982  ;;  %v998_v13 = vmul.f32 %v982_v49, %v870_v26  ;;  %2000 = vtanh.f32 %v955_v20  ;;  %v550_v19 = vmul.f32 0.5, %v2894_v28  ;;  %v872_v8 = vmul.f32 0.5, %v3032_v31 }
 0x251   : > { %1200 = vmatmul.mubr.f32.gmra.mxu0 %v674_v53  ;;  %v1985_v48 = vpop.eup %1984  ;;  %v661_v56 = vadd.f32 1.0, %v1983_v5  ;;  %2002 = vtanh.f32 %v634_v10  ;;  %v873_v42 = vmul.f32 0.5, %v3022_v57  ;;  %v551_v45 = vmul.f32 0.5, %v2903_v34  ;;  %v1022_v5 = vld [vmem:[#allocation2 + $0x58] sm:$0xff] }
 0x252   : > { %1204 = vmatprep.mubr.f32.mxu0 %v996_v58  ;;  %v983_v14 = vadd.f32 1.0, %v1985_v48  ;;  %v874_v28 = vmul.f32 0.5, %v3058_v29  ;;  %v552_v12 = vmul.f32 0.5, %v2900_v32  ;;  %v875_v41 = vmul.f32 0.5, %v3046_v59  ;;  %v1023_v48 = vld [vmem:[#allocation2 + $0x18] sm:$0xff] }
 0x253   : > { %v1987_v17 = vpop.eup %1986  ;;  %v677_v18 = vmul.f32 %v661_v56, %v549_v15  ;;  %v553_v47 = vmul.f32 0.5, %v2911_v40  ;;  %v554_v61 = vmul.f32 0.5, %v2908_v38  ;;  %v1025_v15 = vld [vmem:[#allocation2 + $0x68] sm:$0xff] }
 0x254   : > { %v662_v25 = vadd.f32 1.0, %v1987_v17  ;;  %v999_v37 = vmul.f32 %v983_v14, %v871_v54 }
 0x255   : > { %1205 = vmatmul.mubr.f32.gmra.mxu0 %v675_v63  ;;  %v1989_v27 = vpop.eup %1988 }
 0x256   : > { %1209 = vmatprep.mubr.f32.mxu0 %v997_v4  ;;  %v984_v36 = vadd.f32 1.0, %v1989_v27  ;;  %v678_v44 = vmul.f32 %v662_v25, %v550_v19 }
 0x257   : > { %v1991_v35 = vpop.eup %1990 }
 0x258   : > { %v1993_v46 = vpop.eup %1992  ;;  %v663_v9 = vadd.f32 1.0, %v1991_v35  ;;  %v1000_v30 = vmul.f32 %v984_v36, %v872_v8 }
 0x259   : > { %1210 = vmatmul.mubr.f32.gmra.mxu0 %v676_v11  ;;  %v1995_v39 = vpop.eup %1994  ;;  %v985_v7 = vadd.f32 1.0, %v1993_v46  ;;  %v1024_v11 = vld [vmem:[#allocation2 + $0x50] sm:$0xff] }
 0x25a   : > { %1214 = vmatprep.mubr.f32.mxu0 %v998_v13  ;;  %v1997_v43 = vpop.eup %1996  ;;  %v679_v50 = vmul.f32 %v663_v9, %v551_v45  ;;  %v664_v51 = vadd.f32 1.0, %v1995_v39 }
 0x25b   : > { %v1001_v16 = vmul.f32 %v985_v7, %v873_v42  ;;  %v986_v24 = vadd.f32 1.0, %v1997_v43  ;;  %v1028_v7 = vld [vmem:[#allocation2 + $0x40] sm:$0xff] }
 0x25c   : > { %v1999_v22 = vpop.eup %1998  ;;  %v680_v21 = vmul.f32 %v664_v51, %v552_v12  ;;  %v1030_v12 = vld [vmem:[#allocation2 + $0x10] sm:$0xff] }
 0x25d   : > { %1215 = vmatmul.mubr.f32.gmra.mxu0 %v677_v18  ;;  %v2001_v31 = vpop.eup %2000  ;;  %v665_v57 = vadd.f32 1.0, %v1999_v22  ;;  %v1002_v52 = vmul.f32 %v986_v24, %v874_v28  ;;  %v1029_v22 = vld [vmem:[#allocation2 + $0x20] sm:$0xff] }
 0x25e   : > { %1219 = vmatprep.mubr.f32.mxu0 %v999_v37  ;;  %v2003_v33 = vpop.eup %2002  ;;  %v987_v34 = vadd.f32 1.0, %v2001_v31  ;;  %v1026_v37 = vld [vmem:[#allocation2 + $0x8] sm:$0xff] }
 0x25f   : > { %v681_v53 = vmul.f32 %v665_v57, %v553_v47  ;;  %v666_v29 = vadd.f32 1.0, %v2003_v33 }
 0x260   : > { %v1003_v0 = vmul.f32 %v987_v34, %v875_v41  ;;  %v1031_v41 = vld [vmem:[#allocation2 + $0x38] sm:$0xff] }
 0x261   : > { %1220 = vmatmul.mubr.f32.gmra.mxu0 %v678_v44  ;;  %v682_v32 = vmul.f32 %v666_v29, %v554_v61  ;;  %v1027_v44 = vld [vmem:[#allocation2 + $0x48] sm:$0xff] }
 0x262   : > { %1224 = vmatprep.mubr.f32.mxu0 %v1000_v30 }
 0x265   : > { %1225 = vmatmul.mubr.f32.gmra.mxu0 %v679_v50 }
 0x266   : > { %1229 = vmatprep.mubr.f32.mxu0 %v1001_v16 }
 0x269   : > { %1230 = vmatmul.mubr.f32.gmra.mxu0 %v680_v21 }
 0x26a   : > { %1234 = vmatprep.mubr.f32.mxu0 %v1002_v52 }
 0x26d   : > { %1235 = vmatmul.mubr.f32.gmra.mxu0 %v681_v53 }
 0x26e   : > { %1239 = vmatprep.mubr.f32.mxu0 %v1003_v0  ;;  %v1032_v0 = vld [vmem:[#allocation2 + $0x60] sm:$0xff] }
 0x271   : > { %1240 = vmatmul.mubr.f32.gmra.mxu0 %v682_v32 }
 0x2f5   : > { %v1587_v58 = vpop.f32.mrf.mxu0 }
 0x2f7   : > { %v1588_v62 = vpop.f32.mrf.mxu0 }
 0x2f8   : > { %v1589_v23 = vadd.f32 %v1588_v62, %v1587_v58  ;;  %v1033_v62 = vld [vmem:[#allocation2 + $0x70] sm:$0xff] }
 0x2f9   : > { %v1590_v1 = vpop.f32.mrf.mxu0 }
 0x2fa   : > { %v1245_v59 = vadd.f32 %v1589_v23, %v1020_v60 }
 0x2fb   : > { %v1591_v2 = vpop.f32.mrf.mxu0 }
 0x2fc   : > { %1261 = vst [vmem:[#allocation2 + $0x30] sm:$0xff] %v1245_v59  ;;  %v1592_v40 = vadd.f32 %v1591_v2, %v1590_v1  ;;  %v1034_v2 = vld [vmem:[#allocation2 + $0x78] sm:$0xff] }
 0x2fd   : > { %v1593_v63 = vpop.f32.mrf.mxu0 }
 0x2fe   : > { %v1246_v3 = vadd.f32 %v1592_v40, %v1021_v55 }
 0x2ff   : > { %v1594_v20 = vpop.f32.mrf.mxu0 }
 0x300   : > { %1262 = vst [vmem:[#allocation2] sm:$0xff] %v1246_v3  ;;  %v1595_v4 = vadd.f32 %v1594_v20, %v1593_v63  ;;  %v1035_v20 = vld [vmem:[#allocation2 + $0x28] sm:$0xff] }
 0x301   : > { %v1596_v38 = vpop.f32.mrf.mxu0 }
 0x302   : > { %v1247_v49 = vadd.f32 %v1595_v4, %v1022_v5 }
 0x303   : > { %v1597_v6 = vpop.f32.mrf.mxu0 }
 0x304   : > { %1263 = vst [vmem:[#allocation2 + $0x58] sm:$0xff] %v1247_v49  ;;  %v1598_v26 = vadd.f32 %v1597_v6, %v1596_v38 }
 0x305   : > { %v1599_v17 = vpop.f32.mrf.mxu0 }
 0x306   : > { %v1248_v10 = vadd.f32 %v1598_v26, %v1023_v48 }
 0x307   : > { %v1600_v56 = vpop.f32.mrf.mxu0 }
 0x308   : > { %1264 = vst [vmem:[#allocation2 + $0x18] sm:$0xff] %v1248_v10  ;;  %v1601_v13 = vadd.f32 %v1600_v56, %v1599_v17 }
 0x309   : > { %v1602_v14 = vpop.f32.mrf.mxu0 }
 0x30a   : > { %v1249_v27 = vadd.f32 %v1601_v13, %v1024_v11 }
 0x30b   : > { %v1603_v54 = vpop.f32.mrf.mxu0 }
 0x30c   : > { %1265 = vst [vmem:[#allocation2 + $0x50] sm:$0xff] %v1249_v27  ;;  %v1604_v18 = vadd.f32 %v1603_v54, %v1602_v14 }
 0x30d   : > { %v1605_v25 = vpop.f32.mrf.mxu0 }
 0x30e   : > { %v1250_v35 = vadd.f32 %v1604_v18, %v1025_v15 }
 0x30f   : > { %v1606_v36 = vpop.f32.mrf.mxu0 }
 0x310   : > { %1266 = vst [vmem:[#allocation2 + $0x68] sm:$0xff] %v1250_v35  ;;  %v1607_v46 = vadd.f32 %v1606_v36, %v1605_v25 }
 0x311   : > { %v1608_v19 = vpop.f32.mrf.mxu0 }
 0x312   : > { %v1251_v8 = vadd.f32 %v1607_v46, %v1026_v37 }
 0x313   : > { %v1609_v9 = vpop.f32.mrf.mxu0 }
 0x314   : > { %1267 = vst [vmem:[#allocation2 + $0x8] sm:$0xff] %v1251_v8  ;;  %v1610_v39 = vadd.f32 %v1609_v9, %v1608_v19 }
 0x315   : > { %v1611_v30 = vpop.f32.mrf.mxu0 }
 0x316   : > { %v1252_v42 = vadd.f32 %v1610_v39, %v1027_v44 }
 0x317   : > { %v1612_v43 = vpop.f32.mrf.mxu0 }
 0x318   : > { %1268 = vst [vmem:[#allocation2 + $0x48] sm:$0xff] %v1252_v42  ;;  %v1613_v45 = vadd.f32 %v1612_v43, %v1611_v30 }
 0x319   : > { %v1614_v50 = vpop.f32.mrf.mxu0 }
 0x31a   : > { %v1253_v51 = vadd.f32 %v1613_v45, %v1028_v7 }
 0x31b   : > { %v1615_v28 = vpop.f32.mrf.mxu0 }
 0x31c   : > { %1269 = vst [vmem:[#allocation2 + $0x40] sm:$0xff] %v1253_v51  ;;  %v1616_v16 = vadd.f32 %v1615_v28, %v1614_v50 }
 0x31d   : > { %v1617_v24 = vpop.f32.mrf.mxu0 }
 0x31e   : > { %v1254_v31 = vadd.f32 %v1616_v16, %v1029_v22 }
 0x31f   : > { %v1618_v21 = vpop.f32.mrf.mxu0 }
 0x320   : > { %1270 = vst [vmem:[#allocation2 + $0x20] sm:$0xff] %v1254_v31  ;;  %v1619_v57 = vadd.f32 %v1618_v21, %v1617_v24 }
 0x321   : > { %v1620_v33 = vpop.f32.mrf.mxu0 }
 0x322   : > { %v1255_v52 = vadd.f32 %v1619_v57, %v1030_v12 }
 0x323   : > { %v1621_v34 = vpop.f32.mrf.mxu0 }
 0x324   : > { %1271 = vst [vmem:[#allocation2 + $0x10] sm:$0xff] %v1255_v52  ;;  %v1622_v47 = vadd.f32 %v1621_v34, %v1620_v33 }
 0x325   : > { %v1623_v53 = vpop.f32.mrf.mxu0 }
 0x326   : > { %v1256_v29 = vadd.f32 %v1622_v47, %v1031_v41 }
 0x327   : > { %v1624_v61 = vpop.f32.mrf.mxu0 }
 0x328   : > { %1272 = vst [vmem:[#allocation2 + $0x38] sm:$0xff] %v1256_v29  ;;  %v1625_v32 = vadd.f32 %v1624_v61, %v1623_v53 }
 0x329   : > { %v1626_v58 = vpop.f32.mrf.mxu0 }
 0x32a   : > { %v1257_v60 = vadd.f32 %v1625_v32, %v1032_v0 }
 0x32b   : > { %v1627_v23 = vpop.f32.mrf.mxu0 }
 0x32c   : > { %1273 = vst [vmem:[#allocation2 + $0x60] sm:$0xff] %v1257_v60  ;;  %v1628_v1 = vadd.f32 %v1627_v23, %v1626_v58 }
 0x32d   : > { %v1629_v59 = vpop.f32.mrf.mxu0 }
 0x32e   : > { %v1258_v55 = vadd.f32 %v1628_v1, %v1033_v62 }
 0x32f   : > { %v1630_v40 = vpop.f32.mrf.mxu0 }
 0x330   : > { %1274 = vst [vmem:[#allocation2 + $0x70] sm:$0xff] %v1258_v55  ;;  %v1631_v63 = vadd.f32 %v1630_v40, %v1629_v59 }
 0x331   : > { %v1632_v3 = vpop.f32.mrf.mxu0 }
 0x332   : > { %v1259_v5 = vadd.f32 %v1631_v63, %v1034_v2 }
 0x333   : > { %v1633_v4 = vpop.f32.mrf.mxu0 }
 0x334   : > { %1275 = vst [vmem:[#allocation2 + $0x78] sm:$0xff] %v1259_v5  ;;  %v1634_v38 = vadd.f32 %v1633_v4, %v1632_v3 }
 0x336   : > { %v1260_v49 = vadd.f32 %v1634_v38, %v1035_v20 }
 0x338   : > { %1276 = vst [vmem:[#allocation2 + $0x28] sm:$0xff] %v1260_v49 }
 0x339 PF: > { %s3325_s1 = sld [smem:[#allocation36_spill]] }
 0x33f   : > { %p1481_p12 = scmp.ne.s32.totalorder %s3325_s1, 1 }
 0x341   : > { %1280 = sbr.rel (%p1481_p12) target bundleno = 847 (0x34f), region = 56 }
 0x346   : > { %v1281_v48 = vld [vmem:[#allocation2 + $0x30] sm:$0xff]  ;;  %v1282_v6 = vld [vmem:[#allocation2] sm:$0xff]  ;;  %v1283_v26 = vld [vmem:[#allocation2 + $0x58] sm:$0xff] }
 0x347   : > { %1297 = vst [vmem:[%s2765_s0] sm:$0xff] %v1281_v48  ;;  %1298 = vst [vmem:[%s2765_s0 + $0x8] sm:$0xff] %v1282_v6  ;;  %v1284_v17 = vld [vmem:[#allocation2 + $0x18] sm:$0xff]  ;;  %v1285_v10 = vld [vmem:[#allocation2 + $0x50] sm:$0xff] }
 0x348   : > { %1299 = vst [vmem:[%s2765_s0 + $0x10] sm:$0xff] %v1283_v26  ;;  %v1286_v11 = vld [vmem:[#allocation2 + $0x68] sm:$0xff]  ;;  %1300 = vst [vmem:[%s2765_s0 + $0x18] sm:$0xff] %v1284_v17  ;;  %v1289_v14 = vld [vmem:[#allocation2 + $0x40] sm:$0xff] }
 0x349   : > { %1301 = vst [vmem:[%s2765_s0 + $0x20] sm:$0xff] %v1285_v10  ;;  %1302 = vst [vmem:[%s2765_s0 + $0x28] sm:$0xff] %v1286_v11  ;;  %v1287_v56 = vld [vmem:[#allocation2 + $0x8] sm:$0xff]  ;;  %v1290_v27 = vld [vmem:[#allocation2 + $0x20] sm:$0xff] }
 0x34a   : > { %v1288_v13 = vld [vmem:[#allocation2 + $0x48] sm:$0xff]  ;;  %1303 = vst [vmem:[%s2765_s0 + $0x30] sm:$0xff] %v1287_v56  ;;  %1305 = vst [vmem:[%s2765_s0 + $0x40] sm:$0xff] %v1289_v14  ;;  %v1291_v15 = vld [vmem:[#allocation2 + $0x10] sm:$0xff] }
 0x34b   : > { %1304 = vst [vmem:[%s2765_s0 + $0x38] sm:$0xff] %v1288_v13  ;;  %v1292_v54 = vld [vmem:[#allocation2 + $0x38] sm:$0xff]  ;;  %1306 = vst [vmem:[%s2765_s0 + $0x48] sm:$0xff] %v1290_v27  ;;  %v1293_v18 = vld [vmem:[#allocation2 + $0x60] sm:$0xff] }
 0x34c   : > { %1307 = vst [vmem:[%s2765_s0 + $0x50] sm:$0xff] %v1291_v15  ;;  %1308 = vst [vmem:[%s2765_s0 + $0x58] sm:$0xff] %v1292_v54  ;;  %v1294_v25 = vld [vmem:[#allocation2 + $0x70] sm:$0xff]  ;;  %v1295_v35 = vld [vmem:[#allocation2 + $0x78] sm:$0xff] }
 0x34d   : > { %1309 = vst [vmem:[%s2765_s0 + $0x60] sm:$0xff] %v1293_v18  ;;  %1310 = vst [vmem:[%s2765_s0 + $0x68] sm:$0xff] %v1294_v25  ;;  %v1296_v37 = vld [vmem:[#allocation2 + $0x28] sm:$0xff] }
 0x34e   : > { %1311 = vst [vmem:[%s2765_s0 + $0x70] sm:$0xff] %v1295_v35  ;;  %1312 = vst [vmem:[%s2765_s0 + $0x78] sm:$0xff] %v1296_v37 }
 0x34f PF: > { %s3326_s3 = sld [smem:[#allocation40_spill]]  ;;  %s1328_s6 = sshll.u32 %s2765_s0, 4  ;;  %s3135_s6 = int_to_ptr.vmem [resolvable:$true] %s1328_s6 }
 0x350   : > { %s3328_s29 = sld [smem:[#allocation37_spill]]  ;;  %s3144_s5 = scalar_lea.sflag [#allocation10], %s319_s28 }
 0x351   : > { %s3330_s13 = sld [smem:[#allocation48_spill]]  ;;  %s2120_s20 = scalar_lea.vmem %s3135_s6, 2048 }
 0x352   : > { %p2121_p7 = scmp.ne.s32.totalorder %s3135_s6, %s2120_s20  ;;  %s2312_s10 = smov [#allocation14]  }
 0x353   : > { %s2124_s0 = sshll.u32 %s2312_s10, 4  ;;  %s2125_s0 = int_to_ptr.vmem [resolvable:$false] %s2124_s0 }
 0x354   : > { %s2126_s9 = scalar_lea.vmem %s2125_s0, 4096  ;;  %p2127_p3 = scmp.lt.s32.totalorder %s3135_s6, %s2125_s0 }
 0x355   : > { %p3327_p2 = scmp.ne.s32.totalorder %s3326_s3, 0  ;;  %p2128_p13 = scmp.lt.s32.totalorder %s2126_s9, %s2120_s20 }
 0x357   : > { %s1763_s27 = scalar_select %p3327_p2, [#allocation7], [#allocation20] }
 0x358   : > { %s3387_s29 = smov (!%p3327_p2, %s3328_s29), 0  ;;  %s3331_s24 = smov %s3330_s13 }
 0x359   : > { %s1321_s26 = sld [smem:[%s1763_s27 + %s3387_s29]]  ;;  %p2122_p9 = pnand %p2121_p7, %p3327_p2 }
 0x35a   : > { %p2129_p4 = por %p2128_p13, %p2127_p3 }
 0x35b   : > { %p2123_p6 = pneg %p2122_p9 }
 0x35d   : > { %p2130_p10 = pnand %p2129_p4, %p2123_p6 }
 0x35f   : > { %s1490_s7 = sshll.u32 %s1321_s26, 11 }
 0x360   : > { %s3140_s19 = scalar_lea.hbm %s3330_s13, %s1490_s7 }
 0x361   : > { %2133 = shalt.err (!%p2130_p10)
}
 0x362   : > { %s2134_s28 = scalar_lea.hbm %s3140_s19, 2048  ;;  %s2138_s1 = scalar_lea.hbm %s3331_s24, 8192 }
 0x363   : > { %p2135_p0 = scmp.ne.s32.totalorder %s3140_s19, %s2134_s28  ;;  %p2139_p5 = scmp.lt.s32.totalorder %s3140_s19, %s3331_s24 }
 0x364   : > { %p2140_p11 = scmp.lt.s32.totalorder %s2138_s1, %s2134_s28 }
 0x365   : > { %p2136_p1 = pnand %p2135_p0, %p3327_p2 }
 0x366   : > { %p2141_p12 = por %p2140_p11, %p2139_p5 }
 0x367   : > { %p2137_p8 = pneg %p2136_p1 }
 0x369   : > { %p2142_p7 = pnand %p2141_p12, %p2137_p8 }
 0x36b   : > { %2145 = shalt.err (!%p2142_p7)
}
 0x36c   : > { %s2313_s27 = smov 128   ;;  %s2314_s26 = smov 8  }
 0x36d   : > { %1765 = dma.vmem_to_hbm [thread:$0]  (%p3327_p2), %s3135_s6, 2048, %s3140_s19, %s3144_s5, %s2313_s27, %s2313_s27, %s2314_s26  }
 0x36e PF: > { %s3332_s7 = sld [smem:[#allocation31_spill]]  ;;  %p1792_p9 = scmp.ge.s32.totalorder %s2298_s23, 2 }
 0x36f   : > { %s3333_s15 = sld [smem:[#allocation41_spill]] }
 0x374   : > { %s1343_s2 = sand.u32 1, %s3332_s7  }
 0x375   : > { %p3334_p6 = scmp.ne.s32.totalorder %s3333_s15, 0  ;;  %s1344_s13 = scalar_lea.sflag [#allocation10], %s1343_s2 }
 0x377   : > { %p1788_p3 = pnand %p1792_p9, %p3334_p6 }
 0x379   : > { %p1789_p13 = pneg %p1788_p3 }
 0x37b   : > { %2229 = dma.done.wait (%p1789_p13), %s1344_s13, 2048  }
 0x37c   : > { %2231 = vsyncadd (%p1789_p13), %s1344_s13, 4294965248  ;;  %s37_s23 = sadd.s32 1, %s2298_s23   ;;  %s3336_s2 = sld [smem:[#allocation32_spill]] }
 0x37d   : > { %p3172_p4 = scmp.ge.s32.totalorder %s37_s23, 10   ;;  %s3337_s8 = sld [smem:[#allocation33_spill]] }
 0x37e   : > { %s3338_s9 = sld [smem:[#allocation42_spill]]  ;;  %s3345_s10 = smov %s2250_s11 }
 0x37f   : > { %s3339_s13 = sld [smem:[#allocation34_spill]]  ;;  %s3346_s11 = smov %s2254_s12 }
 0x380   : > { %s3340_s3 = sld [smem:[#allocation35_spill]]  ;;  %s3347_s12 = smov %s2690_s14 }
 0x381   : > { %s3341_s15 = sld [smem:[#allocation43_spill]]  ;;  %s3349_s16 = smov %s2274_s17 }
 0x382   : > { %s3342_s6 = sld [smem:[#allocation44_spill]]  ;;  %s3350_s17 = smov %s2278_s18 }
 0x383   : > { %s3343_s5 = sld [smem:[#allocation38_spill]]  ;;  %s3352_s19 = smov %s2290_s21 }
 0x384   : > { %s3353_s20 = smov %s2294_s22  ;;  %s3354_s21 = smov %s3359_s25 }
 0x385   :  { %36 = sbr.rel (!%p3172_p4) target bundleno = 42 (0x2a), region = 113 }
 0x386   : > { %s3348_s14 = smov %s3340_s3 }
 0x388   : > { %s3351_s18 = smov %s3342_s6 }
 0x389   : > { %s3355_s22 = smov %s3343_s5 }
 0x38a   :  { %1349 = vsyncpa [#allocation9], 1 }
 0x38b   :  { %1351 = vsyncpa [#allocation9 + $0x1], 1 }
 0x38c   :  { %1352 = vsyncpa [#allocation12], 1 }
 0x38d   :  { %1354 = vsyncpa [#allocation12 + $0x1], 1 }
 0x38e   :  { %1355 = vsyncpa [#allocation10], 1 }
 0x38f   :  { %1357 = vsyncpa [#allocation10 + $0x1], 1 }

</bundles_post_ra>
